<compile_context>
chip_gen: v7x
topology: tpu7x:2x2x1
jax: 0.10.0
libtpu: 0.0.40
codegen_flags: <defaults>
</compile_context>

<pallas_src>
import functools

import jax
import jax.numpy as jnp
from jax.experimental import pallas as pl
from jax.experimental.pallas import tpu as pltpu


# ---------------------------------------------------------------------------
# Fused Pallas kernel: all GRU layers + final Linear in one call
# ---------------------------------------------------------------------------

def fused_gru_kernel(x_ref, wih0_ref, bx0_ref, wih_ref, bx_ref, whh_ref, bhn_ref,
                     wfc_ref, bfc_ref, out_ref, xp_ref, act_ref,
                     *, num_layers, seq_len, batch, hidden):
    """Fused multi-layer GRU forward + FC.

    x_ref    : (T*B, D)        time-major, flattened input
    wih0_ref : (D, 3H)         layer-0 input weights, gate columns [r | z | n]
    bx0_ref  : (1, 3H)         layer-0 folded input bias  (b_i* + b_h* for r,z; b_in for n)
    wih_ref  : (L-1, H, 3H)    input weights for layers 1..L-1 (dummy if L == 1)
    bx_ref   : (L-1, 1, 3H)    folded input biases for layers 1..L-1
    whh_ref  : (L, H, 3H)      recurrent weights, fused gates
    bhn_ref  : (L, 1, H)       b_hn per layer (kept separate: multiplied by r)
    wfc_ref  : (H, O)          final Linear weight
    bfc_ref  : (1, O)          final Linear bias
    out_ref  : (B, O)          final output
    xp_ref   : VMEM (T*B, 3H)  scratch: current layer's precomputed input projections
    act_ref  : VMEM (T*B, H)   scratch: current layer's hidden sequence (not used for last layer)
    """
    T, B, H = seq_len, batch, hidden

    # Layer-0 input projection: one big parallel matmul, hoisted out of the recurrence.
    xp_ref[...] = (
        jnp.dot(x_ref[...], wih0_ref[...], preferred_element_type=jnp.float32)
        + bx0_ref[...]
    )

    h_last = None
    for layer in range(num_layers):
        is_last = layer == num_layers - 1
        whh_l = whh_ref[layer]                                # (H, 3H) fused gate weights
        bhn_l = jnp.broadcast_to(bhn_ref[layer], (B, H))      # broadcast hoisted out of time loop

        h = jnp.zeros((B, H), jnp.float32)
        # Recurrence: only a single (B,H)@(H,3H) dot sits on the serial dependency chain.
        for t in range(T):                                    # T small -> fully unrolled, static slices
            xp_t = xp_ref[pl.ds(t * B, B), :]                 # (B, 3H) precomputed x-projection
            hp = jnp.dot(h, whh_l, preferred_element_type=jnp.float32)   # (B, 3H)
            r = jax.nn.sigmoid(xp_t[:, :H] + hp[:, :H])
            z = jax.nn.sigmoid(xp_t[:, H:2 * H] + hp[:, H:2 * H])
            n = jnp.tanh(xp_t[:, 2 * H:] + r * (hp[:, 2 * H:] + bhn_l))
            h = n + z * (h - n)                               # == (1 - z) * n + z * h
            if not is_last:
                act_ref[pl.ds(t * B, B), :] = h               # last layer: only h(T-1) is needed
        h_last = h

        if not is_last:
            # Next layer's input projection: one (T*B, H) @ (H, 3H) parallel matmul.
            xp_ref[...] = (
                jnp.dot(act_ref[...], wih_ref[layer], preferred_element_type=jnp.float32)
                + bx_ref[layer]
            )

    # Final Linear fused onto the last hidden state of the last layer.
    out_ref[...] = (
        jnp.dot(h_last, wfc_ref[...], preferred_element_type=jnp.float32)
        + bfc_ref[...]
    )


# ---------------------------------------------------------------------------
# Wrapper
# ---------------------------------------------------------------------------

@functools.partial(jax.jit, static_argnames=("num_layers", "hidden_size", "output_size"))
def multi_layer_gru_forward(x, kp, *, num_layers, hidden_size, output_size):
    """Equivalent of MultiLayerGRU.forward.

    x  : (batch, input_size, seq) -- exactly what the PyTorch module receives
    kp : kernel-layout params from build_kernel_params()
    """
    B, D, T = x.shape
    H, G, O = hidden_size, 3 * hidden_size, output_size

    # x.permute(0, 2, 1) -> (B, T, D); go time-major and flatten to (T*B, D) so each
    # layer's input projection is a single lane/MXU-friendly matmul (done in XLA, free).
    x_flat = jnp.transpose(x, (2, 0, 1)).reshape(T * B, D).astype(jnp.float32)

    kernel = functools.partial(
        fused_gru_kernel,
        num_layers=num_layers, seq_len=T, batch=B, hidden=H,
    )
    # No grid: single invocation, all operands + scratch resident in VMEM (< 100 KB here).
    # TODO(synk): for very large H, weights should be bf16 + Buffered(1)/manual DMA to
    # respect v7x's 64 MiB VMEM; irrelevant at these shapes.
    return pl.pallas_call(
        kernel,
        out_shape=jax.ShapeDtypeStruct((B, O), jnp.float32),
        scratch_shapes=[
            pltpu.VMEM((T * B, G), jnp.float32),   # per-layer input projections
            pltpu.VMEM((T * B, H), jnp.float32),   # per-layer hidden sequence
        ],
    )(x_flat, kp["wih0"], kp["bx0"], kp["wih_rest"], kp["bx_rest"],
      kp["whh"], kp["bhn"], kp["w_fc"], kp["b_fc"])


# ---------------------------------------------------------------------------
# Parameter init (raw, PyTorch-like) and kernel-layout folding
# ---------------------------------------------------------------------------

def init_params(key, input_size, hidden_size, num_layers, output_size):
    """Raw params: per layer (W_ih^T (Din,3H), W_hh^T (H,3H), b_ih (3H,), b_hh (3H,)), gate order r,z,n."""
    H = hidden_size
    k = 1.0 / jnp.sqrt(H)
    layers = []
    for l in range(num_layers):
        d_in = input_size if l == 0 else H
        key, k1, k2, k3, k4 = jax.random.split(key, 5)
        wih = jax.random.uniform(k1, (d_in, 3 * H), jnp.float32, -k, k)
        whh = jax.random.uniform(k2, (H, 3 * H), jnp.float32, -k, k)
        bih = jax.random.uniform(k3, (3 * H,), jnp.float32, -k, k)
        bhh = jax.random.uniform(k4, (3 * H,), jnp.float32, -k, k)
        layers.append((wih, whh, bih, bhh))
    key, k5, k6 = jax.random.split(key, 3)
    w_fc = jax.random.uniform(k5, (H, output_size), jnp.float32, -k, k)
    b_fc = jax.random.uniform(k6, (output_size,), jnp.float32, -k, k)
    return {"layers": layers, "fc": (w_fc, b_fc)}


def build_kernel_params(params, hidden_size):
    """Fold biases and stack weights into the fused-kernel layout."""
    H = hidden_size
    layers = params["layers"]
    L = len(layers)

    def fold_bx(bih, bhh):
        # b_ir+b_hr and b_iz+b_hz fold into the input-projection bias; b_in stays as-is;
        # b_hn is kept separately (it is multiplied by r inside the n gate).
        return jnp.concatenate([bih[:2 * H] + bhh[:2 * H], bih[2 * H:]])[None, :]  # (1, 3H)

    wih0, _, bih0, bhh0 = layers[0]
    whh = jnp.stack([l[1] for l in layers])                              # (L, H, 3H)
    bhn = jnp.stack([l[3][2 * H:][None, :] for l in layers])             # (L, 1, H)
    if L > 1:
        wih_rest = jnp.stack([layers[l][0] for l in range(1, L)])        # (L-1, H, 3H)
        bx_rest = jnp.stack([fold_bx(layers[l][2], layers[l][3]) for l in range(1, L)])
    else:
        wih_rest = jnp.zeros((1, H, 3 * H), jnp.float32)                 # unused dummies
        bx_rest = jnp.zeros((1, 1, 3 * H), jnp.float32)
    w_fc, b_fc = params["fc"]
    return {
        "wih0": wih0, "bx0": fold_bx(bih0, bhh0),
        "wih_rest": wih_rest, "bx_rest": bx_rest,
        "whh": whh, "bhn": bhn,
        "w_fc": w_fc, "b_fc": b_fc[None, :],
    }


# ---------------------------------------------------------------------------
# Pure-JAX reference (raw params, standard PyTorch GRU equations)
# ---------------------------------------------------------------------------

def reference_forward(x, params, hidden_size):
    H = hidden_size
    h_seq = jnp.transpose(x, (2, 0, 1)).astype(jnp.float32)  # (T, B, D)
    for (wih, whh, bih, bhh) in params["layers"]:
        B = h_seq.shape[1]
        h0 = jnp.zeros((B, H), jnp.float32)

        def step(h, x_t, wih=wih, whh=whh, bih=bih, bhh=bhh):
            gx = x_t @ wih + bih
            gh = h @ whh + bhh
            r = jax.nn.sigmoid(gx[:, :H] + gh[:, :H])
            z = jax.nn.sigmoid(gx[:, H:2 * H] + gh[:, H:2 * H])
            n = jnp.tanh(gx[:, 2 * H:] + r * gh[:, 2 * H:])
            h_new = (1.0 - z) * n + z * h
            return h_new, h_new

        _, h_seq = jax.lax.scan(step, h0, h_seq)
    w_fc, b_fc = params["fc"]
    return h_seq[-1] @ w_fc + b_fc


# ---------------------------------------------------------------------------
# Main
# ---------------------------------------------------------------------------

if __name__ == "__main__":
    batch, input_size, seq_len = 2, 4, 8
    hidden_size, num_layers, output_size = 32, 2, 10

    key = jax.random.PRNGKey(0)
    key, xk, pk = jax.random.split(key, 3)
    # Module input (before the internal permute): (batch, input_size, seq)
    x = jax.random.normal(xk, (batch, input_size, seq_len), jnp.float32)
    params = init_params(pk, input_size, hidden_size, num_layers, output_size)
    kparams = build_kernel_params(params, hidden_size)

    out = multi_layer_gru_forward(
        x, kparams,
        num_layers=num_layers, hidden_size=hidden_size, output_size=output_size,
    )
    out = jax.block_until_ready(out)

    ref = reference_forward(x, params, hidden_size)
    assert out.shape == (batch, output_size)
    assert jnp.allclose(out, ref, rtol=1e-4, atol=1e-4), "Pallas fused GRU mismatch vs reference"

    print("KERNEL_OK")
</pallas_src>

<mosaic_0001>
module attributes {stable_mosaic.version = 11 : i64} {
  func.func @fused_gru_kernel(%arg0: memref<16x4xf32, #tpu.memory_space<vmem>>, %arg1: memref<4x96xf32, #tpu.memory_space<vmem>>, %arg2: memref<1x96xf32, #tpu.memory_space<vmem>>, %arg3: memref<1x32x96xf32, #tpu.memory_space<vmem>>, %arg4: memref<1x1x96xf32, #tpu.memory_space<vmem>>, %arg5: memref<2x32x96xf32, #tpu.memory_space<vmem>>, %arg6: memref<2x1x32xf32, #tpu.memory_space<vmem>>, %arg7: memref<32x10xf32, #tpu.memory_space<vmem>>, %arg8: memref<1x10xf32, #tpu.memory_space<vmem>>, %arg9: memref<2x10xf32, #tpu.memory_space<vmem>>, %arg10: memref<16x96xf32, #tpu.memory_space<vmem>>, %arg11: memref<16x32xf32, #tpu.memory_space<vmem>>) attributes {dimension_semantics = [], scalar_prefetch = 0 : i64, scratch_operands = 2 : i64, tpu.core_type = #tpu.core_type<tc>} {
    %c0 = arith.constant 0 : index
    %c0_0 = arith.constant 0 : index
    %0 = vector.load %arg0[%c0, %c0_0] : memref<16x4xf32, #tpu.memory_space<vmem>>, vector<16x4xf32>
    %c0_1 = arith.constant 0 : index
    %c0_2 = arith.constant 0 : index
    %1 = vector.load %arg1[%c0_1, %c0_2] : memref<4x96xf32, #tpu.memory_space<vmem>>, vector<4x96xf32>
    %cst = arith.constant dense<0.000000e+00> : vector<16x96xf32>
    %2 = tpu.matmul %0, %1, %cst {dimension_numbers = #tpu.dot_dimension_numbers<[1], [0], [0], [1], [0, 0, 1, 1], [], []>} : vector<16x4xf32>, vector<4x96xf32>, vector<16x96xf32> -> vector<16x96xf32>
    %c0_3 = arith.constant 0 : index
    %c0_4 = arith.constant 0 : index
    %3 = vector.load %arg2[%c0_3, %c0_4] : memref<1x96xf32, #tpu.memory_space<vmem>>, vector<1x96xf32>
    %4 = vector.broadcast %3 : vector<1x96xf32> to vector<16x96xf32>
    %5 = arith.addf %2, %4 : vector<16x96xf32>
    %c0_5 = arith.constant 0 : index
    %c0_6 = arith.constant 0 : index
    %6 = vector.load %arg10[%c0_5, %c0_6] : memref<16x96xf32, #tpu.memory_space<vmem>>, vector<16x96xf32>
    tpu.vector_store %arg10[%c0_5, %c0_6], %5 {strides = array<i32>} : memref<16x96xf32, #tpu.memory_space<vmem>>, vector<16x96xf32>,
    %c0_7 = arith.constant 0 : index
    %c0_8 = arith.constant 0 : index
    %c0_9 = arith.constant 0 : index
    %7 = vector.load %arg5[%c0_7, %c0_8, %c0_9] : memref<2x32x96xf32, #tpu.memory_space<vmem>>, vector<1x32x96xf32>
    %8 = vector.shape_cast %7 : vector<1x32x96xf32> to vector<32x96xf32>
    %c0_10 = arith.constant 0 : index
    %c0_11 = arith.constant 0 : index
    %c0_12 = arith.constant 0 : index
    %9 = vector.load %arg6[%c0_10, %c0_11, %c0_12] : memref<2x1x32xf32, #tpu.memory_space<vmem>>, vector<1x1x32xf32>
    %10 = vector.shape_cast %9 : vector<1x1x32xf32> to vector<1x32xf32>
    %11 = vector.shape_cast %10 : vector<1x32xf32> to vector<1x32xf32>
    %12 = vector.broadcast %11 : vector<1x32xf32> to vector<2x32xf32>
    %cst_13 = arith.constant 0.000000e+00 : f32
    %13 = vector.broadcast %cst_13 : f32 to vector<2x32xf32>
    %c0_14 = arith.constant 0 : index
    %c0_15 = arith.constant 0 : index
    %14 = vector.load %arg10[%c0_14, %c0_15] : memref<16x96xf32, #tpu.memory_space<vmem>>, vector<2x96xf32>
    %cst_16 = arith.constant dense<0.000000e+00> : vector<2x96xf32>
    %15 = tpu.matmul %13, %8, %cst_16 {dimension_numbers = #tpu.dot_dimension_numbers<[1], [0], [0], [1], [0, 0, 1, 1], [], []>} : vector<2x32xf32>, vector<32x96xf32>, vector<2x96xf32> -> vector<2x96xf32>
    %16 = vector.extract_strided_slice %14 {offsets = [0, 0], sizes = [2, 32], strides = [1, 1]} : vector<2x96xf32> to vector<2x32xf32>
    %17 = vector.extract_strided_slice %15 {offsets = [0, 0], sizes = [2, 32], strides = [1, 1]} : vector<2x96xf32> to vector<2x32xf32>
    %18 = arith.addf %16, %17 : vector<2x32xf32>
    %19 = arith.negf %18 : vector<2x32xf32>
    %20 = math.exp %19 : vector<2x32xf32>
    %cst_17 = arith.constant 1.000000e+00 : f32
    %21 = vector.broadcast %cst_17 : f32 to vector<2x32xf32>
    %22 = arith.addf %21, %20 : vector<2x32xf32>
    %23 = arith.divf %21, %22 : vector<2x32xf32>
    %24 = vector.extract_strided_slice %14 {offsets = [0, 32], sizes = [2, 32], strides = [1, 1]} : vector<2x96xf32> to vector<2x32xf32>
    %25 = vector.extract_strided_slice %15 {offsets = [0, 32], sizes = [2, 32], strides = [1, 1]} : vector<2x96xf32> to vector<2x32xf32>
    %26 = arith.addf %24, %25 : vector<2x32xf32>
    %27 = arith.negf %26 : vector<2x32xf32>
    %28 = math.exp %27 : vector<2x32xf32>
    %cst_18 = arith.constant 1.000000e+00 : f32
    %29 = vector.broadcast %cst_18 : f32 to vector<2x32xf32>
    %30 = arith.addf %29, %28 : vector<2x32xf32>
    %31 = arith.divf %29, %30 : vector<2x32xf32>
    %32 = vector.extract_strided_slice %14 {offsets = [0, 64], sizes = [2, 32], strides = [1, 1]} : vector<2x96xf32> to vector<2x32xf32>
    %33 = vector.extract_strided_slice %15 {offsets = [0, 64], sizes = [2, 32], strides = [1, 1]} : vector<2x96xf32> to vector<2x32xf32>
    %34 = arith.addf %33, %12 : vector<2x32xf32>
    %35 = arith.mulf %23, %34 : vector<2x32xf32>
    %36 = arith.addf %32, %35 : vector<2x32xf32>
    %37 = math.tanh %36 : vector<2x32xf32>
    %38 = arith.subf %13, %37 : vector<2x32xf32>
    %39 = arith.mulf %31, %38 : vector<2x32xf32>
    %40 = arith.addf %37, %39 : vector<2x32xf32>
    %c0_19 = arith.constant 0 : index
    %c0_20 = arith.constant 0 : index
    %41 = vector.load %arg11[%c0_19, %c0_20] : memref<16x32xf32, #tpu.memory_space<vmem>>, vector<2x32xf32>
    tpu.vector_store %arg11[%c0_19, %c0_20], %40 {strides = array<i32>} : memref<16x32xf32, #tpu.memory_space<vmem>>, vector<2x32xf32>,
    %c2 = arith.constant 2 : index
    %c0_21 = arith.constant 0 : index
    %42 = vector.load %arg10[%c2, %c0_21] : memref<16x96xf32, #tpu.memory_space<vmem>>, vector<2x96xf32>
    %cst_22 = arith.constant dense<0.000000e+00> : vector<2x96xf32>
    %43 = tpu.matmul %40, %8, %cst_22 {dimension_numbers = #tpu.dot_dimension_numbers<[1], [0], [0], [1], [0, 0, 1, 1], [], []>} : vector<2x32xf32>, vector<32x96xf32>, vector<2x96xf32> -> vector<2x96xf32>
    %44 = vector.extract_strided_slice %42 {offsets = [0, 0], sizes = [2, 32], strides = [1, 1]} : vector<2x96xf32> to vector<2x32xf32>
    %45 = vector.extract_strided_slice %43 {offsets = [0, 0], sizes = [2, 32], strides = [1, 1]} : vector<2x96xf32> to vector<2x32xf32>
    %46 = arith.addf %44, %45 : vector<2x32xf32>
    %47 = arith.negf %46 : vector<2x32xf32>
    %48 = math.exp %47 : vector<2x32xf32>
    %cst_23 = arith.constant 1.000000e+00 : f32
    %49 = vector.broadcast %cst_23 : f32 to vector<2x32xf32>
    %50 = arith.addf %49, %48 : vector<2x32xf32>
    %51 = arith.divf %49, %50 : vector<2x32xf32>
    %52 = vector.extract_strided_slice %42 {offsets = [0, 32], sizes = [2, 32], strides = [1, 1]} : vector<2x96xf32> to vector<2x32xf32>
    %53 = vector.extract_strided_slice %43 {offsets = [0, 32], sizes = [2, 32], strides = [1, 1]} : vector<2x96xf32> to vector<2x32xf32>
    %54 = arith.addf %52, %53 : vector<2x32xf32>
    %55 = arith.negf %54 : vector<2x32xf32>
    %56 = math.exp %55 : vector<2x32xf32>
    %cst_24 = arith.constant 1.000000e+00 : f32
    %57 = vector.broadcast %cst_24 : f32 to vector<2x32xf32>
    %58 = arith.addf %57, %56 : vector<2x32xf32>
    %59 = arith.divf %57, %58 : vector<2x32xf32>
    %60 = vector.extract_strided_slice %42 {offsets = [0, 64], sizes = [2, 32], strides = [1, 1]} : vector<2x96xf32> to vector<2x32xf32>
    %61 = vector.extract_strided_slice %43 {offsets = [0, 64], sizes = [2, 32], strides = [1, 1]} : vector<2x96xf32> to vector<2x32xf32>
    %62 = arith.addf %61, %12 : vector<2x32xf32>
    %63 = arith.mulf %51, %62 : vector<2x32xf32>
    %64 = arith.addf %60, %63 : vector<2x32xf32>
    %65 = math.tanh %64 : vector<2x32xf32>
    %66 = arith.subf %40, %65 : vector<2x32xf32>
    %67 = arith.mulf %59, %66 : vector<2x32xf32>
    %68 = arith.addf %65, %67 : vector<2x32xf32>
    %c2_25 = arith.constant 2 : index
    %c0_26 = arith.constant 0 : index
    %69 = vector.load %arg11[%c2_25, %c0_26] : memref<16x32xf32, #tpu.memory_space<vmem>>, vector<2x32xf32>
    tpu.vector_store %arg11[%c2_25, %c0_26], %68 {strides = array<i32>} : memref<16x32xf32, #tpu.memory_space<vmem>>, vector<2x32xf32>,
    %c4 = arith.constant 4 : index
    %c0_27 = arith.constant 0 : index
    %70 = vector.load %arg10[%c4, %c0_27] : memref<16x96xf32, #tpu.memory_space<vmem>>, vector<2x96xf32>
    %cst_28 = arith.constant dense<0.000000e+00> : vector<2x96xf32>
    %71 = tpu.matmul %68, %8, %cst_28 {dimension_numbers = #tpu.dot_dimension_numbers<[1], [0], [0], [1], [0, 0, 1, 1], [], []>} : vector<2x32xf32>, vector<32x96xf32>, vector<2x96xf32> -> vector<2x96xf32>
    %72 = vector.extract_strided_slice %70 {offsets = [0, 0], sizes = [2, 32], strides = [1, 1]} : vector<2x96xf32> to vector<2x32xf32>
    %73 = vector.extract_strided_slice %71 {offsets = [0, 0], sizes = [2, 32], strides = [1, 1]} : vector<2x96xf32> to vector<2x32xf32>
    %74 = arith.addf %72, %73 : vector<2x32xf32>
    %75 = arith.negf %74 : vector<2x32xf32>
    %76 = math.exp %75 : vector<2x32xf32>
    %cst_29 = arith.constant 1.000000e+00 : f32
    %77 = vector.broadcast %cst_29 : f32 to vector<2x32xf32>
    %78 = arith.addf %77, %76 : vector<2x32xf32>
    %79 = arith.divf %77, %78 : vector<2x32xf32>
    %80 = vector.extract_strided_slice %70 {offsets = [0, 32], sizes = [2, 32], strides = [1, 1]} : vector<2x96xf32> to vector<2x32xf32>
    %81 = vector.extract_strided_slice %71 {offsets = [0, 32], sizes = [2, 32], strides = [1, 1]} : vector<2x96xf32> to vector<2x32xf32>
    %82 = arith.addf %80, %81 : vector<2x32xf32>
    %83 = arith.negf %82 : vector<2x32xf32>
    %84 = math.exp %83 : vector<2x32xf32>
    %cst_30 = arith.constant 1.000000e+00 : f32
    %85 = vector.broadcast %cst_30 : f32 to vector<2x32xf32>
    %86 = arith.addf %85, %84 : vector<2x32xf32>
    %87 = arith.divf %85, %86 : vector<2x32xf32>
    %88 = vector.extract_strided_slice %70 {offsets = [0, 64], sizes = [2, 32], strides = [1, 1]} : vector<2x96xf32> to vector<2x32xf32>
    %89 = vector.extract_strided_slice %71 {offsets = [0, 64], sizes = [2, 32], strides = [1, 1]} : vector<2x96xf32> to vector<2x32xf32>
    %90 = arith.addf %89, %12 : vector<2x32xf32>
    %91 = arith.mulf %79, %90 : vector<2x32xf32>
    %92 = arith.addf %88, %91 : vector<2x32xf32>
    %93 = math.tanh %92 : vector<2x32xf32>
    %94 = arith.subf %68, %93 : vector<2x32xf32>
    %95 = arith.mulf %87, %94 : vector<2x32xf32>
    %96 = arith.addf %93, %95 : vector<2x32xf32>
    %c4_31 = arith.constant 4 : index
    %c0_32 = arith.constant 0 : index
    %97 = vector.load %arg11[%c4_31, %c0_32] : memref<16x32xf32, #tpu.memory_space<vmem>>, vector<2x32xf32>
    tpu.vector_store %arg11[%c4_31, %c0_32], %96 {strides = array<i32>} : memref<16x32xf32, #tpu.memory_space<vmem>>, vector<2x32xf32>,
    %c6 = arith.constant 6 : index
    %c0_33 = arith.constant 0 : index
    %98 = vector.load %arg10[%c6, %c0_33] : memref<16x96xf32, #tpu.memory_space<vmem>>, vector<2x96xf32>
    %cst_34 = arith.constant dense<0.000000e+00> : vector<2x96xf32>
    %99 = tpu.matmul %96, %8, %cst_34 {dimension_numbers = #tpu.dot_dimension_numbers<[1], [0], [0], [1], [0, 0, 1, 1], [], []>} : vector<2x32xf32>, vector<32x96xf32>, vector<2x96xf32> -> vector<2x96xf32>
    %100 = vector.extract_strided_slice %98 {offsets = [0, 0], sizes = [2, 32], strides = [1, 1]} : vector<2x96xf32> to vector<2x32xf32>
    %101 = vector.extract_strided_slice %99 {offsets = [0, 0], sizes = [2, 32], strides = [1, 1]} : vector<2x96xf32> to vector<2x32xf32>
    %102 = arith.addf %100, %101 : vector<2x32xf32>
    %103 = arith.negf %102 : vector<2x32xf32>
    %104 = math.exp %103 : vector<2x32xf32>
    %cst_35 = arith.constant 1.000000e+00 : f32
    %105 = vector.broadcast %cst_35 : f32 to vector<2x32xf32>
    %106 = arith.addf %105, %104 : vector<2x32xf32>
    %107 = arith.divf %105, %106 : vector<2x32xf32>
    %108 = vector.extract_strided_slice %98 {offsets = [0, 32], sizes = [2, 32], strides = [1, 1]} : vector<2x96xf32> to vector<2x32xf32>
    %109 = vector.extract_strided_slice %99 {offsets = [0, 32], sizes = [2, 32], strides = [1, 1]} : vector<2x96xf32> to vector<2x32xf32>
    %110 = arith.addf %108, %109 : vector<2x32xf32>
    %111 = arith.negf %110 : vector<2x32xf32>
    %112 = math.exp %111 : vector<2x32xf32>
    %cst_36 = arith.constant 1.000000e+00 : f32
    %113 = vector.broadcast %cst_36 : f32 to vector<2x32xf32>
    %114 = arith.addf %113, %112 : vector<2x32xf32>
    %115 = arith.divf %113, %114 : vector<2x32xf32>
    %116 = vector.extract_strided_slice %98 {offsets = [0, 64], sizes = [2, 32], strides = [1, 1]} : vector<2x96xf32> to vector<2x32xf32>
    %117 = vector.extract_strided_slice %99 {offsets = [0, 64], sizes = [2, 32], strides = [1, 1]} : vector<2x96xf32> to vector<2x32xf32>
    %118 = arith.addf %117, %12 : vector<2x32xf32>
    %119 = arith.mulf %107, %118 : vector<2x32xf32>
    %120 = arith.addf %116, %119 : vector<2x32xf32>
    %121 = math.tanh %120 : vector<2x32xf32>
    %122 = arith.subf %96, %121 : vector<2x32xf32>
    %123 = arith.mulf %115, %122 : vector<2x32xf32>
    %124 = arith.addf %121, %123 : vector<2x32xf32>
    %c6_37 = arith.constant 6 : index
    %c0_38 = arith.constant 0 : index
    %125 = vector.load %arg11[%c6_37, %c0_38] : memref<16x32xf32, #tpu.memory_space<vmem>>, vector<2x32xf32>
    tpu.vector_store %arg11[%c6_37, %c0_38], %124 {strides = array<i32>} : memref<16x32xf32, #tpu.memory_space<vmem>>, vector<2x32xf32>,
    %c8 = arith.constant 8 : index
    %c0_39 = arith.constant 0 : index
    %126 = vector.load %arg10[%c8, %c0_39] : memref<16x96xf32, #tpu.memory_space<vmem>>, vector<2x96xf32>
    %cst_40 = arith.constant dense<0.000000e+00> : vector<2x96xf32>
    %127 = tpu.matmul %124, %8, %cst_40 {dimension_numbers = #tpu.dot_dimension_numbers<[1], [0], [0], [1], [0, 0, 1, 1], [], []>} : vector<2x32xf32>, vector<32x96xf32>, vector<2x96xf32> -> vector<2x96xf32>
    %128 = vector.extract_strided_slice %126 {offsets = [0, 0], sizes = [2, 32], strides = [1, 1]} : vector<2x96xf32> to vector<2x32xf32>
    %129 = vector.extract_strided_slice %127 {offsets = [0, 0], sizes = [2, 32], strides = [1, 1]} : vector<2x96xf32> to vector<2x32xf32>
    %130 = arith.addf %128, %129 : vector<2x32xf32>
    %131 = arith.negf %130 : vector<2x32xf32>
    %132 = math.exp %131 : vector<2x32xf32>
    %cst_41 = arith.constant 1.000000e+00 : f32
    %133 = vector.broadcast %cst_41 : f32 to vector<2x32xf32>
    %134 = arith.addf %133, %132 : vector<2x32xf32>
    %135 = arith.divf %133, %134 : vector<2x32xf32>
    %136 = vector.extract_strided_slice %126 {offsets = [0, 32], sizes = [2, 32], strides = [1, 1]} : vector<2x96xf32> to vector<2x32xf32>
    %137 = vector.extract_strided_slice %127 {offsets = [0, 32], sizes = [2, 32], strides = [1, 1]} : vector<2x96xf32> to vector<2x32xf32>
    %138 = arith.addf %136, %137 : vector<2x32xf32>
    %139 = arith.negf %138 : vector<2x32xf32>
    %140 = math.exp %139 : vector<2x32xf32>
    %cst_42 = arith.constant 1.000000e+00 : f32
    %141 = vector.broadcast %cst_42 : f32 to vector<2x32xf32>
    %142 = arith.addf %141, %140 : vector<2x32xf32>
    %143 = arith.divf %141, %142 : vector<2x32xf32>
    %144 = vector.extract_strided_slice %126 {offsets = [0, 64], sizes = [2, 32], strides = [1, 1]} : vector<2x96xf32> to vector<2x32xf32>
    %145 = vector.extract_strided_slice %127 {offsets = [0, 64], sizes = [2, 32], strides = [1, 1]} : vector<2x96xf32> to vector<2x32xf32>
    %146 = arith.addf %145, %12 : vector<2x32xf32>
    %147 = arith.mulf %135, %146 : vector<2x32xf32>
    %148 = arith.addf %144, %147 : vector<2x32xf32>
    %149 = math.tanh %148 : vector<2x32xf32>
    %150 = arith.subf %124, %149 : vector<2x32xf32>
    %151 = arith.mulf %143, %150 : vector<2x32xf32>
    %152 = arith.addf %149, %151 : vector<2x32xf32>
    %c8_43 = arith.constant 8 : index
    %c0_44 = arith.constant 0 : index
    %153 = vector.load %arg11[%c8_43, %c0_44] : memref<16x32xf32, #tpu.memory_space<vmem>>, vector<2x32xf32>
    tpu.vector_store %arg11[%c8_43, %c0_44], %152 {strides = array<i32>} : memref<16x32xf32, #tpu.memory_space<vmem>>, vector<2x32xf32>,
    %c10 = arith.constant 10 : index
    %c0_45 = arith.constant 0 : index
    %154 = vector.load %arg10[%c10, %c0_45] : memref<16x96xf32, #tpu.memory_space<vmem>>, vector<2x96xf32>
    %cst_46 = arith.constant dense<0.000000e+00> : vector<2x96xf32>
    %155 = tpu.matmul %152, %8, %cst_46 {dimension_numbers = #tpu.dot_dimension_numbers<[1], [0], [0], [1], [0, 0, 1, 1], [], []>} : vector<2x32xf32>, vector<32x96xf32>, vector<2x96xf32> -> vector<2x96xf32>
    %156 = vector.extract_strided_slice %154 {offsets = [0, 0], sizes = [2, 32], strides = [1, 1]} : vector<2x96xf32> to vector<2x32xf32>
    %157 = vector.extract_strided_slice %155 {offsets = [0, 0], sizes = [2, 32], strides = [1, 1]} : vector<2x96xf32> to vector<2x32xf32>
    %158 = arith.addf %156, %157 : vector<2x32xf32>
    %159 = arith.negf %158 : vector<2x32xf32>
    %160 = math.exp %159 : vector<2x32xf32>
    %cst_47 = arith.constant 1.000000e+00 : f32
    %161 = vector.broadcast %cst_47 : f32 to vector<2x32xf32>
    %162 = arith.addf %161, %160 : vector<2x32xf32>
    %163 = arith.divf %161, %162 : vector<2x32xf32>
    %164 = vector.extract_strided_slice %154 {offsets = [0, 32], sizes = [2, 32], strides = [1, 1]} : vector<2x96xf32> to vector<2x32xf32>
    %165 = vector.extract_strided_slice %155 {offsets = [0, 32], sizes = [2, 32], strides = [1, 1]} : vector<2x96xf32> to vector<2x32xf32>
    %166 = arith.addf %164, %165 : vector<2x32xf32>
    %167 = arith.negf %166 : vector<2x32xf32>
    %168 = math.exp %167 : vector<2x32xf32>
    %cst_48 = arith.constant 1.000000e+00 : f32
    %169 = vector.broadcast %cst_48 : f32 to vector<2x32xf32>
    %170 = arith.addf %169, %168 : vector<2x32xf32>
    %171 = arith.divf %169, %170 : vector<2x32xf32>
    %172 = vector.extract_strided_slice %154 {offsets = [0, 64], sizes = [2, 32], strides = [1, 1]} : vector<2x96xf32> to vector<2x32xf32>
    %173 = vector.extract_strided_slice %155 {offsets = [0, 64], sizes = [2, 32], strides = [1, 1]} : vector<2x96xf32> to vector<2x32xf32>
    %174 = arith.addf %173, %12 : vector<2x32xf32>
    %175 = arith.mulf %163, %174 : vector<2x32xf32>
    %176 = arith.addf %172, %175 : vector<2x32xf32>
    %177 = math.tanh %176 : vector<2x32xf32>
    %178 = arith.subf %152, %177 : vector<2x32xf32>
    %179 = arith.mulf %171, %178 : vector<2x32xf32>
    %180 = arith.addf %177, %179 : vector<2x32xf32>
    %c10_49 = arith.constant 10 : index
    %c0_50 = arith.constant 0 : index
    %181 = vector.load %arg11[%c10_49, %c0_50] : memref<16x32xf32, #tpu.memory_space<vmem>>, vector<2x32xf32>
    tpu.vector_store %arg11[%c10_49, %c0_50], %180 {strides = array<i32>} : memref<16x32xf32, #tpu.memory_space<vmem>>, vector<2x32xf32>,
    %c12 = arith.constant 12 : index
    %c0_51 = arith.constant 0 : index
    %182 = vector.load %arg10[%c12, %c0_51] : memref<16x96xf32, #tpu.memory_space<vmem>>, vector<2x96xf32>
    %cst_52 = arith.constant dense<0.000000e+00> : vector<2x96xf32>
    %183 = tpu.matmul %180, %8, %cst_52 {dimension_numbers = #tpu.dot_dimension_numbers<[1], [0], [0], [1], [0, 0, 1, 1], [], []>} : vector<2x32xf32>, vector<32x96xf32>, vector<2x96xf32> -> vector<2x96xf32>
    %184 = vector.extract_strided_slice %182 {offsets = [0, 0], sizes = [2, 32], strides = [1, 1]} : vector<2x96xf32> to vector<2x32xf32>
    %185 = vector.extract_strided_slice %183 {offsets = [0, 0], sizes = [2, 32], strides = [1, 1]} : vector<2x96xf32> to vector<2x32xf32>
    %186 = arith.addf %184, %185 : vector<2x32xf32>
    %187 = arith.negf %186 : vector<2x32xf32>
    %188 = math.exp %187 : vector<2x32xf32>
    %cst_53 = arith.constant 1.000000e+00 : f32
    %189 = vector.broadcast %cst_53 : f32 to vector<2x32xf32>
    %190 = arith.addf %189, %188 : vector<2x32xf32>
    %191 = arith.divf %189, %190 : vector<2x32xf32>
    %192 = vector.extract_strided_slice %182 {offsets = [0, 32], sizes = [2, 32], strides = [1, 1]} : vector<2x96xf32> to vector<2x32xf32>
    %193 = vector.extract_strided_slice %183 {offsets = [0, 32], sizes = [2, 32], strides = [1, 1]} : vector<2x96xf32> to vector<2x32xf32>
    %194 = arith.addf %192, %193 : vector<2x32xf32>
    %195 = arith.negf %194 : vector<2x32xf32>
    %196 = math.exp %195 : vector<2x32xf32>
    %cst_54 = arith.constant 1.000000e+00 : f32
    %197 = vector.broadcast %cst_54 : f32 to vector<2x32xf32>
    %198 = arith.addf %197, %196 : vector<2x32xf32>
    %199 = arith.divf %197, %198 : vector<2x32xf32>
    %200 = vector.extract_strided_slice %182 {offsets = [0, 64], sizes = [2, 32], strides = [1, 1]} : vector<2x96xf32> to vector<2x32xf32>
    %201 = vector.extract_strided_slice %183 {offsets = [0, 64], sizes = [2, 32], strides = [1, 1]} : vector<2x96xf32> to vector<2x32xf32>
    %202 = arith.addf %201, %12 : vector<2x32xf32>
    %203 = arith.mulf %191, %202 : vector<2x32xf32>
    %204 = arith.addf %200, %203 : vector<2x32xf32>
    %205 = math.tanh %204 : vector<2x32xf32>
    %206 = arith.subf %180, %205 : vector<2x32xf32>
    %207 = arith.mulf %199, %206 : vector<2x32xf32>
    %208 = arith.addf %205, %207 : vector<2x32xf32>
    %c12_55 = arith.constant 12 : index
    %c0_56 = arith.constant 0 : index
    %209 = vector.load %arg11[%c12_55, %c0_56] : memref<16x32xf32, #tpu.memory_space<vmem>>, vector<2x32xf32>
    tpu.vector_store %arg11[%c12_55, %c0_56], %208 {strides = array<i32>} : memref<16x32xf32, #tpu.memory_space<vmem>>, vector<2x32xf32>,
    %c14 = arith.constant 14 : index
    %c0_57 = arith.constant 0 : index
    %210 = vector.load %arg10[%c14, %c0_57] : memref<16x96xf32, #tpu.memory_space<vmem>>, vector<2x96xf32>
    %cst_58 = arith.constant dense<0.000000e+00> : vector<2x96xf32>
    %211 = tpu.matmul %208, %8, %cst_58 {dimension_numbers = #tpu.dot_dimension_numbers<[1], [0], [0], [1], [0, 0, 1, 1], [], []>} : vector<2x32xf32>, vector<32x96xf32>, vector<2x96xf32> -> vector<2x96xf32>
    %212 = vector.extract_strided_slice %210 {offsets = [0, 0], sizes = [2, 32], strides = [1, 1]} : vector<2x96xf32> to vector<2x32xf32>
    %213 = vector.extract_strided_slice %211 {offsets = [0, 0], sizes = [2, 32], strides = [1, 1]} : vector<2x96xf32> to vector<2x32xf32>
    %214 = arith.addf %212, %213 : vector<2x32xf32>
    %215 = arith.negf %214 : vector<2x32xf32>
    %216 = math.exp %215 : vector<2x32xf32>
    %cst_59 = arith.constant 1.000000e+00 : f32
    %217 = vector.broadcast %cst_59 : f32 to vector<2x32xf32>
    %218 = arith.addf %217, %216 : vector<2x32xf32>
    %219 = arith.divf %217, %218 : vector<2x32xf32>
    %220 = vector.extract_strided_slice %210 {offsets = [0, 32], sizes = [2, 32], strides = [1, 1]} : vector<2x96xf32> to vector<2x32xf32>
    %221 = vector.extract_strided_slice %211 {offsets = [0, 32], sizes = [2, 32], strides = [1, 1]} : vector<2x96xf32> to vector<2x32xf32>
    %222 = arith.addf %220, %221 : vector<2x32xf32>
    %223 = arith.negf %222 : vector<2x32xf32>
    %224 = math.exp %223 : vector<2x32xf32>
    %cst_60 = arith.constant 1.000000e+00 : f32
    %225 = vector.broadcast %cst_60 : f32 to vector<2x32xf32>
    %226 = arith.addf %225, %224 : vector<2x32xf32>
    %227 = arith.divf %225, %226 : vector<2x32xf32>
    %228 = vector.extract_strided_slice %210 {offsets = [0, 64], sizes = [2, 32], strides = [1, 1]} : vector<2x96xf32> to vector<2x32xf32>
    %229 = vector.extract_strided_slice %211 {offsets = [0, 64], sizes = [2, 32], strides = [1, 1]} : vector<2x96xf32> to vector<2x32xf32>
    %230 = arith.addf %229, %12 : vector<2x32xf32>
    %231 = arith.mulf %219, %230 : vector<2x32xf32>
    %232 = arith.addf %228, %231 : vector<2x32xf32>
    %233 = math.tanh %232 : vector<2x32xf32>
    %234 = arith.subf %208, %233 : vector<2x32xf32>
    %235 = arith.mulf %227, %234 : vector<2x32xf32>
    %236 = arith.addf %233, %235 : vector<2x32xf32>
    %c14_61 = arith.constant 14 : index
    %c0_62 = arith.constant 0 : index
    %237 = vector.load %arg11[%c14_61, %c0_62] : memref<16x32xf32, #tpu.memory_space<vmem>>, vector<2x32xf32>
    tpu.vector_store %arg11[%c14_61, %c0_62], %236 {strides = array<i32>} : memref<16x32xf32, #tpu.memory_space<vmem>>, vector<2x32xf32>,
    %c0_63 = arith.constant 0 : index
    %c0_64 = arith.constant 0 : index
    %238 = vector.load %arg11[%c0_63, %c0_64] : memref<16x32xf32, #tpu.memory_space<vmem>>, vector<16x32xf32>
    %c0_65 = arith.constant 0 : index
    %c0_66 = arith.constant 0 : index
    %c0_67 = arith.constant 0 : index
    %239 = vector.load %arg3[%c0_65, %c0_66, %c0_67] : memref<1x32x96xf32, #tpu.memory_space<vmem>>, vector<1x32x96xf32>
    %240 = vector.shape_cast %239 : vector<1x32x96xf32> to vector<32x96xf32>
    %cst_68 = arith.constant dense<0.000000e+00> : vector<16x96xf32>
    %241 = tpu.matmul %238, %240, %cst_68 {dimension_numbers = #tpu.dot_dimension_numbers<[1], [0], [0], [1], [0, 0, 1, 1], [], []>} : vector<16x32xf32>, vector<32x96xf32>, vector<16x96xf32> -> vector<16x96xf32>
    %c0_69 = arith.constant 0 : index
    %c0_70 = arith.constant 0 : index
    %c0_71 = arith.constant 0 : index
    %242 = vector.load %arg4[%c0_69, %c0_70, %c0_71] : memref<1x1x96xf32, #tpu.memory_space<vmem>>, vector<1x1x96xf32>
    %243 = vector.shape_cast %242 : vector<1x1x96xf32> to vector<1x96xf32>
    %244 = vector.broadcast %243 : vector<1x96xf32> to vector<16x96xf32>
    %245 = arith.addf %241, %244 : vector<16x96xf32>
    %c0_72 = arith.constant 0 : index
    %c0_73 = arith.constant 0 : index
    %246 = vector.load %arg10[%c0_72, %c0_73] : memref<16x96xf32, #tpu.memory_space<vmem>>, vector<16x96xf32>
    tpu.vector_store %arg10[%c0_72, %c0_73], %245 {strides = array<i32>} : memref<16x96xf32, #tpu.memory_space<vmem>>, vector<16x96xf32>,
    %c1 = arith.constant 1 : index
    %c0_74 = arith.constant 0 : index
    %c0_75 = arith.constant 0 : index
    %247 = vector.load %arg5[%c1, %c0_74, %c0_75] : memref<2x32x96xf32, #tpu.memory_space<vmem>>, vector<1x32x96xf32>
    %248 = vector.shape_cast %247 : vector<1x32x96xf32> to vector<32x96xf32>
    %c1_76 = arith.constant 1 : index
    %c0_77 = arith.constant 0 : index
    %c0_78 = arith.constant 0 : index
    %249 = vector.load %arg6[%c1_76, %c0_77, %c0_78] : memref<2x1x32xf32, #tpu.memory_space<vmem>>, vector<1x1x32xf32>
    %250 = vector.shape_cast %249 : vector<1x1x32xf32> to vector<1x32xf32>
    %251 = vector.shape_cast %250 : vector<1x32xf32> to vector<1x32xf32>
    %252 = vector.broadcast %251 : vector<1x32xf32> to vector<2x32xf32>
    %cst_79 = arith.constant 0.000000e+00 : f32
    %253 = vector.broadcast %cst_79 : f32 to vector<2x32xf32>
    %c0_80 = arith.constant 0 : index
    %c0_81 = arith.constant 0 : index
    %254 = vector.load %arg10[%c0_80, %c0_81] : memref<16x96xf32, #tpu.memory_space<vmem>>, vector<2x96xf32>
    %cst_82 = arith.constant dense<0.000000e+00> : vector<2x96xf32>
    %255 = tpu.matmul %253, %248, %cst_82 {dimension_numbers = #tpu.dot_dimension_numbers<[1], [0], [0], [1], [0, 0, 1, 1], [], []>} : vector<2x32xf32>, vector<32x96xf32>, vector<2x96xf32> -> vector<2x96xf32>
    %256 = vector.extract_strided_slice %254 {offsets = [0, 0], sizes = [2, 32], strides = [1, 1]} : vector<2x96xf32> to vector<2x32xf32>
    %257 = vector.extract_strided_slice %255 {offsets = [0, 0], sizes = [2, 32], strides = [1, 1]} : vector<2x96xf32> to vector<2x32xf32>
    %258 = arith.addf %256, %257 : vector<2x32xf32>
    %259 = arith.negf %258 : vector<2x32xf32>
    %260 = math.exp %259 : vector<2x32xf32>
    %cst_83 = arith.constant 1.000000e+00 : f32
    %261 = vector.broadcast %cst_83 : f32 to vector<2x32xf32>
    %262 = arith.addf %261, %260 : vector<2x32xf32>
    %263 = arith.divf %261, %262 : vector<2x32xf32>
    %264 = vector.extract_strided_slice %254 {offsets = [0, 32], sizes = [2, 32], strides = [1, 1]} : vector<2x96xf32> to vector<2x32xf32>
    %265 = vector.extract_strided_slice %255 {offsets = [0, 32], sizes = [2, 32], strides = [1, 1]} : vector<2x96xf32> to vector<2x32xf32>
    %266 = arith.addf %264, %265 : vector<2x32xf32>
    %267 = arith.negf %266 : vector<2x32xf32>
    %268 = math.exp %267 : vector<2x32xf32>
    %cst_84 = arith.constant 1.000000e+00 : f32
    %269 = vector.broadcast %cst_84 : f32 to vector<2x32xf32>
    %270 = arith.addf %269, %268 : vector<2x32xf32>
    %271 = arith.divf %269, %270 : vector<2x32xf32>
    %272 = vector.extract_strided_slice %254 {offsets = [0, 64], sizes = [2, 32], strides = [1, 1]} : vector<2x96xf32> to vector<2x32xf32>
    %273 = vector.extract_strided_slice %255 {offsets = [0, 64], sizes = [2, 32], strides = [1, 1]} : vector<2x96xf32> to vector<2x32xf32>
    %274 = arith.addf %273, %252 : vector<2x32xf32>
    %275 = arith.mulf %263, %274 : vector<2x32xf32>
    %276 = arith.addf %272, %275 : vector<2x32xf32>
    %277 = math.tanh %276 : vector<2x32xf32>
    %278 = arith.subf %253, %277 : vector<2x32xf32>
    %279 = arith.mulf %271, %278 : vector<2x32xf32>
    %280 = arith.addf %277, %279 : vector<2x32xf32>
    %c2_85 = arith.constant 2 : index
    %c0_86 = arith.constant 0 : index
    %281 = vector.load %arg10[%c2_85, %c0_86] : memref<16x96xf32, #tpu.memory_space<vmem>>, vector<2x96xf32>
    %cst_87 = arith.constant dense<0.000000e+00> : vector<2x96xf32>
    %282 = tpu.matmul %280, %248, %cst_87 {dimension_numbers = #tpu.dot_dimension_numbers<[1], [0], [0], [1], [0, 0, 1, 1], [], []>} : vector<2x32xf32>, vector<32x96xf32>, vector<2x96xf32> -> vector<2x96xf32>
    %283 = vector.extract_strided_slice %281 {offsets = [0, 0], sizes = [2, 32], strides = [1, 1]} : vector<2x96xf32> to vector<2x32xf32>
    %284 = vector.extract_strided_slice %282 {offsets = [0, 0], sizes = [2, 32], strides = [1, 1]} : vector<2x96xf32> to vector<2x32xf32>
    %285 = arith.addf %283, %284 : vector<2x32xf32>
    %286 = arith.negf %285 : vector<2x32xf32>
    %287 = math.exp %286 : vector<2x32xf32>
    %cst_88 = arith.constant 1.000000e+00 : f32
    %288 = vector.broadcast %cst_88 : f32 to vector<2x32xf32>
    %289 = arith.addf %288, %287 : vector<2x32xf32>
    %290 = arith.divf %288, %289 : vector<2x32xf32>
    %291 = vector.extract_strided_slice %281 {offsets = [0, 32], sizes = [2, 32], strides = [1, 1]} : vector<2x96xf32> to vector<2x32xf32>
    %292 = vector.extract_strided_slice %282 {offsets = [0, 32], sizes = [2, 32], strides = [1, 1]} : vector<2x96xf32> to vector<2x32xf32>
    %293 = arith.addf %291, %292 : vector<2x32xf32>
    %294 = arith.negf %293 : vector<2x32xf32>
    %295 = math.exp %294 : vector<2x32xf32>
    %cst_89 = arith.constant 1.000000e+00 : f32
    %296 = vector.broadcast %cst_89 : f32 to vector<2x32xf32>
    %297 = arith.addf %296, %295 : vector<2x32xf32>
    %298 = arith.divf %296, %297 : vector<2x32xf32>
    %299 = vector.extract_strided_slice %281 {offsets = [0, 64], sizes = [2, 32], strides = [1, 1]} : vector<2x96xf32> to vector<2x32xf32>
    %300 = vector.extract_strided_slice %282 {offsets = [0, 64], sizes = [2, 32], strides = [1, 1]} : vector<2x96xf32> to vector<2x32xf32>
    %301 = arith.addf %300, %252 : vector<2x32xf32>
    %302 = arith.mulf %290, %301 : vector<2x32xf32>
    %303 = arith.addf %299, %302 : vector<2x32xf32>
    %304 = math.tanh %303 : vector<2x32xf32>
    %305 = arith.subf %280, %304 : vector<2x32xf32>
    %306 = arith.mulf %298, %305 : vector<2x32xf32>
    %307 = arith.addf %304, %306 : vector<2x32xf32>
    %c4_90 = arith.constant 4 : index
    %c0_91 = arith.constant 0 : index
    %308 = vector.load %arg10[%c4_90, %c0_91] : memref<16x96xf32, #tpu.memory_space<vmem>>, vector<2x96xf32>
    %cst_92 = arith.constant dense<0.000000e+00> : vector<2x96xf32>
    %309 = tpu.matmul %307, %248, %cst_92 {dimension_numbers = #tpu.dot_dimension_numbers<[1], [0], [0], [1], [0, 0, 1, 1], [], []>} : vector<2x32xf32>, vector<32x96xf32>, vector<2x96xf32> -> vector<2x96xf32>
    %310 = vector.extract_strided_slice %308 {offsets = [0, 0], sizes = [2, 32], strides = [1, 1]} : vector<2x96xf32> to vector<2x32xf32>
    %311 = vector.extract_strided_slice %309 {offsets = [0, 0], sizes = [2, 32], strides = [1, 1]} : vector<2x96xf32> to vector<2x32xf32>
    %312 = arith.addf %310, %311 : vector<2x32xf32>
    %313 = arith.negf %312 : vector<2x32xf32>
    %314 = math.exp %313 : vector<2x32xf32>
    %cst_93 = arith.constant 1.000000e+00 : f32
    %315 = vector.broadcast %cst_93 : f32 to vector<2x32xf32>
    %316 = arith.addf %315, %314 : vector<2x32xf32>
    %317 = arith.divf %315, %316 : vector<2x32xf32>
    %318 = vector.extract_strided_slice %308 {offsets = [0, 32], sizes = [2, 32], strides = [1, 1]} : vector<2x96xf32> to vector<2x32xf32>
    %319 = vector.extract_strided_slice %309 {offsets = [0, 32], sizes = [2, 32], strides = [1, 1]} : vector<2x96xf32> to vector<2x32xf32>
    %320 = arith.addf %318, %319 : vector<2x32xf32>
    %321 = arith.negf %320 : vector<2x32xf32>
    %322 = math.exp %321 : vector<2x32xf32>
    %cst_94 = arith.constant 1.000000e+00 : f32
    %323 = vector.broadcast %cst_94 : f32 to vector<2x32xf32>
    %324 = arith.addf %323, %322 : vector<2x32xf32>
    %325 = arith.divf %323, %324 : vector<2x32xf32>
    %326 = vector.extract_strided_slice %308 {offsets = [0, 64], sizes = [2, 32], strides = [1, 1]} : vector<2x96xf32> to vector<2x32xf32>
    %327 = vector.extract_strided_slice %309 {offsets = [0, 64], sizes = [2, 32], strides = [1, 1]} : vector<2x96xf32> to vector<2x32xf32>
    %328 = arith.addf %327, %252 : vector<2x32xf32>
    %329 = arith.mulf %317, %328 : vector<2x32xf32>
    %330 = arith.addf %326, %329 : vector<2x32xf32>
    %331 = math.tanh %330 : vector<2x32xf32>
    %332 = arith.subf %307, %331 : vector<2x32xf32>
    %333 = arith.mulf %325, %332 : vector<2x32xf32>
    %334 = arith.addf %331, %333 : vector<2x32xf32>
    %c6_95 = arith.constant 6 : index
    %c0_96 = arith.constant 0 : index
    %335 = vector.load %arg10[%c6_95, %c0_96] : memref<16x96xf32, #tpu.memory_space<vmem>>, vector<2x96xf32>
    %cst_97 = arith.constant dense<0.000000e+00> : vector<2x96xf32>
    %336 = tpu.matmul %334, %248, %cst_97 {dimension_numbers = #tpu.dot_dimension_numbers<[1], [0], [0], [1], [0, 0, 1, 1], [], []>} : vector<2x32xf32>, vector<32x96xf32>, vector<2x96xf32> -> vector<2x96xf32>
    %337 = vector.extract_strided_slice %335 {offsets = [0, 0], sizes = [2, 32], strides = [1, 1]} : vector<2x96xf32> to vector<2x32xf32>
    %338 = vector.extract_strided_slice %336 {offsets = [0, 0], sizes = [2, 32], strides = [1, 1]} : vector<2x96xf32> to vector<2x32xf32>
    %339 = arith.addf %337, %338 : vector<2x32xf32>
    %340 = arith.negf %339 : vector<2x32xf32>
    %341 = math.exp %340 : vector<2x32xf32>
    %cst_98 = arith.constant 1.000000e+00 : f32
    %342 = vector.broadcast %cst_98 : f32 to vector<2x32xf32>
    %343 = arith.addf %342, %341 : vector<2x32xf32>
    %344 = arith.divf %342, %343 : vector<2x32xf32>
    %345 = vector.extract_strided_slice %335 {offsets = [0, 32], sizes = [2, 32], strides = [1, 1]} : vector<2x96xf32> to vector<2x32xf32>
    %346 = vector.extract_strided_slice %336 {offsets = [0, 32], sizes = [2, 32], strides = [1, 1]} : vector<2x96xf32> to vector<2x32xf32>
    %347 = arith.addf %345, %346 : vector<2x32xf32>
    %348 = arith.negf %347 : vector<2x32xf32>
    %349 = math.exp %348 : vector<2x32xf32>
    %cst_99 = arith.constant 1.000000e+00 : f32
    %350 = vector.broadcast %cst_99 : f32 to vector<2x32xf32>
    %351 = arith.addf %350, %349 : vector<2x32xf32>
    %352 = arith.divf %350, %351 : vector<2x32xf32>
    %353 = vector.extract_strided_slice %335 {offsets = [0, 64], sizes = [2, 32], strides = [1, 1]} : vector<2x96xf32> to vector<2x32xf32>
    %354 = vector.extract_strided_slice %336 {offsets = [0, 64], sizes = [2, 32], strides = [1, 1]} : vector<2x96xf32> to vector<2x32xf32>
    %355 = arith.addf %354, %252 : vector<2x32xf32>
    %356 = arith.mulf %344, %355 : vector<2x32xf32>
    %357 = arith.addf %353, %356 : vector<2x32xf32>
    %358 = math.tanh %357 : vector<2x32xf32>
    %359 = arith.subf %334, %358 : vector<2x32xf32>
    %360 = arith.mulf %352, %359 : vector<2x32xf32>
    %361 = arith.addf %358, %360 : vector<2x32xf32>
    %c8_100 = arith.constant 8 : index
    %c0_101 = arith.constant 0 : index
    %362 = vector.load %arg10[%c8_100, %c0_101] : memref<16x96xf32, #tpu.memory_space<vmem>>, vector<2x96xf32>
    %cst_102 = arith.constant dense<0.000000e+00> : vector<2x96xf32>
    %363 = tpu.matmul %361, %248, %cst_102 {dimension_numbers = #tpu.dot_dimension_numbers<[1], [0], [0], [1], [0, 0, 1, 1], [], []>} : vector<2x32xf32>, vector<32x96xf32>, vector<2x96xf32> -> vector<2x96xf32>
    %364 = vector.extract_strided_slice %362 {offsets = [0, 0], sizes = [2, 32], strides = [1, 1]} : vector<2x96xf32> to vector<2x32xf32>
    %365 = vector.extract_strided_slice %363 {offsets = [0, 0], sizes = [2, 32], strides = [1, 1]} : vector<2x96xf32> to vector<2x32xf32>
    %366 = arith.addf %364, %365 : vector<2x32xf32>
    %367 = arith.negf %366 : vector<2x32xf32>
    %368 = math.exp %367 : vector<2x32xf32>
    %cst_103 = arith.constant 1.000000e+00 : f32
    %369 = vector.broadcast %cst_103 : f32 to vector<2x32xf32>
    %370 = arith.addf %369, %368 : vector<2x32xf32>
    %371 = arith.divf %369, %370 : vector<2x32xf32>
    %372 = vector.extract_strided_slice %362 {offsets = [0, 32], sizes = [2, 32], strides = [1, 1]} : vector<2x96xf32> to vector<2x32xf32>
    %373 = vector.extract_strided_slice %363 {offsets = [0, 32], sizes = [2, 32], strides = [1, 1]} : vector<2x96xf32> to vector<2x32xf32>
    %374 = arith.addf %372, %373 : vector<2x32xf32>
    %375 = arith.negf %374 : vector<2x32xf32>
    %376 = math.exp %375 : vector<2x32xf32>
    %cst_104 = arith.constant 1.000000e+00 : f32
    %377 = vector.broadcast %cst_104 : f32 to vector<2x32xf32>
    %378 = arith.addf %377, %376 : vector<2x32xf32>
    %379 = arith.divf %377, %378 : vector<2x32xf32>
    %380 = vector.extract_strided_slice %362 {offsets = [0, 64], sizes = [2, 32], strides = [1, 1]} : vector<2x96xf32> to vector<2x32xf32>
    %381 = vector.extract_strided_slice %363 {offsets = [0, 64], sizes = [2, 32], strides = [1, 1]} : vector<2x96xf32> to vector<2x32xf32>
    %382 = arith.addf %381, %252 : vector<2x32xf32>
    %383 = arith.mulf %371, %382 : vector<2x32xf32>
    %384 = arith.addf %380, %383 : vector<2x32xf32>
    %385 = math.tanh %384 : vector<2x32xf32>
    %386 = arith.subf %361, %385 : vector<2x32xf32>
    %387 = arith.mulf %379, %386 : vector<2x32xf32>
    %388 = arith.addf %385, %387 : vector<2x32xf32>
    %c10_105 = arith.constant 10 : index
    %c0_106 = arith.constant 0 : index
    %389 = vector.load %arg10[%c10_105, %c0_106] : memref<16x96xf32, #tpu.memory_space<vmem>>, vector<2x96xf32>
    %cst_107 = arith.constant dense<0.000000e+00> : vector<2x96xf32>
    %390 = tpu.matmul %388, %248, %cst_107 {dimension_numbers = #tpu.dot_dimension_numbers<[1], [0], [0], [1], [0, 0, 1, 1], [], []>} : vector<2x32xf32>, vector<32x96xf32>, vector<2x96xf32> -> vector<2x96xf32>
    %391 = vector.extract_strided_slice %389 {offsets = [0, 0], sizes = [2, 32], strides = [1, 1]} : vector<2x96xf32> to vector<2x32xf32>
    %392 = vector.extract_strided_slice %390 {offsets = [0, 0], sizes = [2, 32], strides = [1, 1]} : vector<2x96xf32> to vector<2x32xf32>
    %393 = arith.addf %391, %392 : vector<2x32xf32>
    %394 = arith.negf %393 : vector<2x32xf32>
    %395 = math.exp %394 : vector<2x32xf32>
    %cst_108 = arith.constant 1.000000e+00 : f32
    %396 = vector.broadcast %cst_108 : f32 to vector<2x32xf32>
    %397 = arith.addf %396, %395 : vector<2x32xf32>
    %398 = arith.divf %396, %397 : vector<2x32xf32>
    %399 = vector.extract_strided_slice %389 {offsets = [0, 32], sizes = [2, 32], strides = [1, 1]} : vector<2x96xf32> to vector<2x32xf32>
    %400 = vector.extract_strided_slice %390 {offsets = [0, 32], sizes = [2, 32], strides = [1, 1]} : vector<2x96xf32> to vector<2x32xf32>
    %401 = arith.addf %399, %400 : vector<2x32xf32>
    %402 = arith.negf %401 : vector<2x32xf32>
    %403 = math.exp %402 : vector<2x32xf32>
    %cst_109 = arith.constant 1.000000e+00 : f32
    %404 = vector.broadcast %cst_109 : f32 to vector<2x32xf32>
    %405 = arith.addf %404, %403 : vector<2x32xf32>
    %406 = arith.divf %404, %405 : vector<2x32xf32>
    %407 = vector.extract_strided_slice %389 {offsets = [0, 64], sizes = [2, 32], strides = [1, 1]} : vector<2x96xf32> to vector<2x32xf32>
    %408 = vector.extract_strided_slice %390 {offsets = [0, 64], sizes = [2, 32], strides = [1, 1]} : vector<2x96xf32> to vector<2x32xf32>
    %409 = arith.addf %408, %252 : vector<2x32xf32>
    %410 = arith.mulf %398, %409 : vector<2x32xf32>
    %411 = arith.addf %407, %410 : vector<2x32xf32>
    %412 = math.tanh %411 : vector<2x32xf32>
    %413 = arith.subf %388, %412 : vector<2x32xf32>
    %414 = arith.mulf %406, %413 : vector<2x32xf32>
    %415 = arith.addf %412, %414 : vector<2x32xf32>
    %c12_110 = arith.constant 12 : index
    %c0_111 = arith.constant 0 : index
    %416 = vector.load %arg10[%c12_110, %c0_111] : memref<16x96xf32, #tpu.memory_space<vmem>>, vector<2x96xf32>
    %cst_112 = arith.constant dense<0.000000e+00> : vector<2x96xf32>
    %417 = tpu.matmul %415, %248, %cst_112 {dimension_numbers = #tpu.dot_dimension_numbers<[1], [0], [0], [1], [0, 0, 1, 1], [], []>} : vector<2x32xf32>, vector<32x96xf32>, vector<2x96xf32> -> vector<2x96xf32>
    %418 = vector.extract_strided_slice %416 {offsets = [0, 0], sizes = [2, 32], strides = [1, 1]} : vector<2x96xf32> to vector<2x32xf32>
    %419 = vector.extract_strided_slice %417 {offsets = [0, 0], sizes = [2, 32], strides = [1, 1]} : vector<2x96xf32> to vector<2x32xf32>
    %420 = arith.addf %418, %419 : vector<2x32xf32>
    %421 = arith.negf %420 : vector<2x32xf32>
    %422 = math.exp %421 : vector<2x32xf32>
    %cst_113 = arith.constant 1.000000e+00 : f32
    %423 = vector.broadcast %cst_113 : f32 to vector<2x32xf32>
    %424 = arith.addf %423, %422 : vector<2x32xf32>
    %425 = arith.divf %423, %424 : vector<2x32xf32>
    %426 = vector.extract_strided_slice %416 {offsets = [0, 32], sizes = [2, 32], strides = [1, 1]} : vector<2x96xf32> to vector<2x32xf32>
    %427 = vector.extract_strided_slice %417 {offsets = [0, 32], sizes = [2, 32], strides = [1, 1]} : vector<2x96xf32> to vector<2x32xf32>
    %428 = arith.addf %426, %427 : vector<2x32xf32>
    %429 = arith.negf %428 : vector<2x32xf32>
    %430 = math.exp %429 : vector<2x32xf32>
    %cst_114 = arith.constant 1.000000e+00 : f32
    %431 = vector.broadcast %cst_114 : f32 to vector<2x32xf32>
    %432 = arith.addf %431, %430 : vector<2x32xf32>
    %433 = arith.divf %431, %432 : vector<2x32xf32>
    %434 = vector.extract_strided_slice %416 {offsets = [0, 64], sizes = [2, 32], strides = [1, 1]} : vector<2x96xf32> to vector<2x32xf32>
    %435 = vector.extract_strided_slice %417 {offsets = [0, 64], sizes = [2, 32], strides = [1, 1]} : vector<2x96xf32> to vector<2x32xf32>
    %436 = arith.addf %435, %252 : vector<2x32xf32>
    %437 = arith.mulf %425, %436 : vector<2x32xf32>
    %438 = arith.addf %434, %437 : vector<2x32xf32>
    %439 = math.tanh %438 : vector<2x32xf32>
    %440 = arith.subf %415, %439 : vector<2x32xf32>
    %441 = arith.mulf %433, %440 : vector<2x32xf32>
    %442 = arith.addf %439, %441 : vector<2x32xf32>
    %c14_115 = arith.constant 14 : index
    %c0_116 = arith.constant 0 : index
    %443 = vector.load %arg10[%c14_115, %c0_116] : memref<16x96xf32, #tpu.memory_space<vmem>>, vector<2x96xf32>
    %cst_117 = arith.constant dense<0.000000e+00> : vector<2x96xf32>
    %444 = tpu.matmul %442, %248, %cst_117 {dimension_numbers = #tpu.dot_dimension_numbers<[1], [0], [0], [1], [0, 0, 1, 1], [], []>} : vector<2x32xf32>, vector<32x96xf32>, vector<2x96xf32> -> vector<2x96xf32>
    %445 = vector.extract_strided_slice %443 {offsets = [0, 0], sizes = [2, 32], strides = [1, 1]} : vector<2x96xf32> to vector<2x32xf32>
    %446 = vector.extract_strided_slice %444 {offsets = [0, 0], sizes = [2, 32], strides = [1, 1]} : vector<2x96xf32> to vector<2x32xf32>
    %447 = arith.addf %445, %446 : vector<2x32xf32>
    %448 = arith.negf %447 : vector<2x32xf32>
    %449 = math.exp %448 : vector<2x32xf32>
    %cst_118 = arith.constant 1.000000e+00 : f32
    %450 = vector.broadcast %cst_118 : f32 to vector<2x32xf32>
    %451 = arith.addf %450, %449 : vector<2x32xf32>
    %452 = arith.divf %450, %451 : vector<2x32xf32>
    %453 = vector.extract_strided_slice %443 {offsets = [0, 32], sizes = [2, 32], strides = [1, 1]} : vector<2x96xf32> to vector<2x32xf32>
    %454 = vector.extract_strided_slice %444 {offsets = [0, 32], sizes = [2, 32], strides = [1, 1]} : vector<2x96xf32> to vector<2x32xf32>
    %455 = arith.addf %453, %454 : vector<2x32xf32>
    %456 = arith.negf %455 : vector<2x32xf32>
    %457 = math.exp %456 : vector<2x32xf32>
    %cst_119 = arith.constant 1.000000e+00 : f32
    %458 = vector.broadcast %cst_119 : f32 to vector<2x32xf32>
    %459 = arith.addf %458, %457 : vector<2x32xf32>
    %460 = arith.divf %458, %459 : vector<2x32xf32>
    %461 = vector.extract_strided_slice %443 {offsets = [0, 64], sizes = [2, 32], strides = [1, 1]} : vector<2x96xf32> to vector<2x32xf32>
    %462 = vector.extract_strided_slice %444 {offsets = [0, 64], sizes = [2, 32], strides = [1, 1]} : vector<2x96xf32> to vector<2x32xf32>
    %463 = arith.addf %462, %252 : vector<2x32xf32>
    %464 = arith.mulf %452, %463 : vector<2x32xf32>
    %465 = arith.addf %461, %464 : vector<2x32xf32>
    %466 = math.tanh %465 : vector<2x32xf32>
    %467 = arith.subf %442, %466 : vector<2x32xf32>
    %468 = arith.mulf %460, %467 : vector<2x32xf32>
    %469 = arith.addf %466, %468 : vector<2x32xf32>
    %c0_120 = arith.constant 0 : index
    %c0_121 = arith.constant 0 : index
    %470 = vector.load %arg7[%c0_120, %c0_121] : memref<32x10xf32, #tpu.memory_space<vmem>>, vector<32x10xf32>
    %cst_122 = arith.constant dense<0.000000e+00> : vector<2x10xf32>
    %471 = tpu.matmul %469, %470, %cst_122 {dimension_numbers = #tpu.dot_dimension_numbers<[1], [0], [0], [1], [0, 0, 1, 1], [], []>} : vector<2x32xf32>, vector<32x10xf32>, vector<2x10xf32> -> vector<2x10xf32>
    %c0_123 = arith.constant 0 : index
    %c0_124 = arith.constant 0 : index
    %472 = vector.load %arg8[%c0_123, %c0_124] : memref<1x10xf32, #tpu.memory_space<vmem>>, vector<1x10xf32>
    %473 = vector.broadcast %472 : vector<1x10xf32> to vector<2x10xf32>
    %474 = arith.addf %471, %473 : vector<2x10xf32>
    %c0_125 = arith.constant 0 : index
    %c0_126 = arith.constant 0 : index
    %475 = vector.load %arg9[%c0_125, %c0_126] : memref<2x10xf32, #tpu.memory_space<vmem>>, vector<2x10xf32>
    tpu.vector_store %arg9[%c0_125, %c0_126], %474 {strides = array<i32>} : memref<2x10xf32, #tpu.memory_space<vmem>>, vector<2x10xf32>,
    return
  }
}

</mosaic_0001>

<bundles_post_ra>
// kernel: multi_layer_gru_forward.1
= control target key start
LH: loop header
LB: loop body
LE: loop exit
PB: predicated region body
PF: predicated region fallthrough
CT: control target
= control target key end

     0   :  { %14 = vsyncpa [#allocation5], 0  ;;  %s3170_s0 = inlined_call_operand.vmem [shape: f32[16,4], index: 0, kind: input, shape index: {}]   ;;  %s3171_s1 = inlined_call_operand.vmem [shape: f32[4,96], index: 1, kind: input, shape index: {}]   ;;  %s3172_s2 = inlined_call_operand.hbm [shape: f32[1,96], index: 2, kind: input, shape index: {}]   ;;  %s3173_s3 = inlined_call_operand.vmem [shape: f32[1,32,96], index: 3, kind: input, shape index: {}]   ;;  %s3174_s4 = inlined_call_operand.hbm [shape: f32[1,1,96], index: 4, kind: input, shape index: {}]   ;;  %s3175_s5 = inlined_call_operand.vmem [shape: f32[2,32,96], index: 5, kind: input, shape index: {}]   ;;  %s3176_s6 = inlined_call_operand.vmem [shape: f32[2,1,32], index: 6, kind: input, shape index: {}]   ;;  %s3177_s7 = inlined_call_operand.vmem [shape: f32[32,10], index: 7, kind: input, shape index: {}]   ;;  %s3178_s8 = inlined_call_operand.hbm [shape: f32[1,10], index: 8, kind: input, shape index: {}]   ;;  %s3179_s9 = inlined_call_operand.hbm [shape: f32[2,10], index: 9, kind: output, shape index: {}]  }
   0x1   :  { %15 = vsyncpa [#allocation8], 0 }
   0x2   :  { %16 = vsyncpa [#allocation6], 0  ;;  %s2758_s30 = smov [#allocation7]   ;;  %s2759_s11 = smov [#allocation4]  }
   0x3   :  { %s39_s10 = sshll.u32 %s2758_s30, 4  ;;  %s27_s12 = sshll.u32 %s2759_s11, 4  ;;  %s40_s10 = int_to_ptr.vmem [resolvable:$true] %s39_s10  ;;  %s28_s12 = int_to_ptr.vmem [resolvable:$true] %s27_s12 }
   0x4   :  { %s2664_s15 = scalar_lea.hbm %s3174_s4, 16 }
   0x5   :  { %p2665_p0 = scmp.ne.s32.totalorder %s3174_s4, %s2664_s15  ;;  %p2668_p1 = scmp.lt.u32.totalorder %s2664_s15, %s3174_s4 }
   0x7   :  { %p2670_p2 = pnand %p2668_p1, %p2665_p0 }
   0x9   :  { %2673 = shalt.err (!%p2670_p2)
}
   0xa   :  { %s2674_s20 = scalar_lea.vmem %s40_s10, 16  ;;  %s2678_s21 = scalar_lea.vmem %s40_s10, 32 }
   0xb   :  { %p2675_p3 = scmp.ne.s32.totalorder %s40_s10, %s2674_s20  ;;  %p2679_p4 = scmp.lt.s32.totalorder %s40_s10, %s40_s10 }
   0xc   :  { %p2680_p5 = scmp.lt.s32.totalorder %s2678_s21, %s2674_s20 }
   0xe   :  { %p2681_p6 = por %p2680_p5, %p2679_p4 }
  0x10   :  { %p2682_p7 = pnand %p2681_p6, %p2675_p3 }
  0x12   :  { %2685 = shalt.err (!%p2682_p7)
}
  0x13   :  { %42 = dma.hbm_to_vmem [thread:$0]  %s3174_s4, 16, %s40_s10, [#allocation8]  }
  0x14   :  { %s2686_s26 = scalar_lea.hbm %s3172_s2, 16 }
  0x15   :  { %p2687_p8 = scmp.ne.s32.totalorder %s3172_s2, %s2686_s26  ;;  %p2690_p9 = scmp.lt.u32.totalorder %s2686_s26, %s3172_s2 }
  0x17   :  { %p2692_p10 = pnand %p2690_p9, %p2687_p8 }
  0x19   :  { %2695 = shalt.err (!%p2692_p10)
}
  0x1a   :  { %s2696_s11 = scalar_lea.vmem %s28_s12, 16  ;;  %s2700_s13 = scalar_lea.vmem %s28_s12, 32 }
  0x1b   :  { %p2697_p11 = scmp.ne.s32.totalorder %s28_s12, %s2696_s11  ;;  %p2701_p12 = scmp.lt.s32.totalorder %s28_s12, %s28_s12 }
  0x1c   :  { %p2702_p13 = scmp.lt.s32.totalorder %s2700_s13, %s2696_s11 }
  0x1e   :  { %p2703_p0 = por %p2702_p13, %p2701_p12 }
  0x20   :  { %p2704_p1 = pnand %p2703_p0, %p2697_p11 }
  0x22   :  { %2707 = shalt.err (!%p2704_p1)
}
  0x23   :  { %30 = dma.hbm_to_vmem [thread:$0]  %s3172_s2, 16, %s28_s12, [#allocation5]  }
  0x24   :  { %s2760_s14 = smov [#allocation9]   ;;  %s2708_s18 = scalar_lea.hbm %s3178_s8, 16 }
  0x25   :  { %s55_s15 = sshll.u32 %s2760_s14, 4  ;;  %p2709_p2 = scmp.ne.s32.totalorder %s3178_s8, %s2708_s18  ;;  %s56_s15 = int_to_ptr.vmem [resolvable:$true] %s55_s15 }
  0x26   :  { %p2712_p3 = scmp.lt.u32.totalorder %s2708_s18, %s3178_s8 }
  0x28   :  { %p2714_p4 = pnand %p2712_p3, %p2709_p2 }
  0x2a   :  { %2717 = shalt.err (!%p2714_p4)
}
  0x2b   :  { %s2718_s23 = scalar_lea.vmem %s56_s15, 16  ;;  %s2722_s2 = scalar_lea.vmem %s56_s15, 32 }
  0x2c   :  { %p2719_p5 = scmp.ne.s32.totalorder %s56_s15, %s2718_s23  ;;  %p2723_p6 = scmp.lt.s32.totalorder %s56_s15, %s56_s15 }
  0x2d   :  { %p2724_p7 = scmp.lt.s32.totalorder %s2722_s2, %s2718_s23 }
  0x2f   :  { %p2725_p8 = por %p2724_p7, %p2723_p6 }
  0x31   :  { %p2726_p9 = pnand %p2725_p8, %p2719_p5 }
  0x33   :  { %2729 = shalt.err (!%p2726_p9)
}
  0x34   :  { %58 = dma.hbm_to_vmem [thread:$0]  %s3178_s8, 16, %s56_s15, [#allocation8]  }
  0x35   :  { %2752 = dma.done.wait [#allocation5], 16  }
  0x36   :  { %2753 = vsyncadd [#allocation5], 4294967280 }
  0x37   :  { %2754 = dma.done.wait [#allocation8], 32  }
  0x38   :  { %2755 = vsyncadd [#allocation8], 4294967264  ;;  %v2761_v0 = vmov 0.0|0.0   ;;  %vm2762_vm0 = vmmov 0   ;;  %v2763_v1 = vmov 0.0   ;;  %vm85_vm1 = vcmask 1043456  }
  0x39   :  { %2448 = vmatprep.subr.bf16.mxu1 %v2761_v0  ;;  %2258 = vmatprep.mubr.msk.f32.mxu1 %vm2762_vm0, %v2763_v1  ;;  %vm78_vm2 = vcmask 31744   ;;  %v70_v2 = vld [vmem:[%s3171_s1] sm:$0xf]  ;;  %v69_v4 = vld [vmem:[%s3170_s0 + $0x8] sm:$0xff]  ;;  %v169_v7 = vld [vmem:[%s3175_s5 + $0x10] sm:$0xff]  ;;  %s2764_s17 = smov 64  }
  0x3a   :  { %v68_v3 = vld [vmem:[%s3170_s0] sm:$0xff]  ;;  %2245 = vmatprep.subr.msk.mxu0 %vm85_vm1, %v70_v2  ;;  %v168_v6 = vld [vmem:[%s3175_s5 + $0x8] sm:$0xff]  ;;  %v170_v9 = vld [vmem:[%s3175_s5 + $0x18] sm:$0xff]  ;;  %vm164_vm3 = vcmask 785408   ;;  %s2765_s18 = smov 96   ;;  %s2766_s19 = smov 32  }
  0x3b   :  { %2247 = vmatprep.mubr.msk.f32.mxu0 %vm78_vm2, %v68_v3  ;;  %v167_v5 = vld [vmem:[%s3175_s5] sm:$0xff]  ;;  %2246 = vmatpush3.msk.msra.mxu0 %vm85_vm1, %v70_v2  ;;  %v2885_v11 = vpack.c.bf16 %v170_v9, %v169_v7  ;;  %vm289_vm4 = vcmask 254976   ;;  %vm178_vm5 = vcmask 261120   ;;  %vm2087_vm6 = vcmask 74752  }
  0x3c   :  { %v2875_v8 = vpack.c.bf16 %v168_v6, %v167_v5  ;;  %v2109_v10 = vld [vmem:[%s3176_s6] ss:$0 sm:$0xff]  ;;  %2248 = vmatmul.mubr.msk.f32.vlgmr.msra.gmra.mrb[0].mxu0 %vm78_vm2, %v69_v4  ;;  %2454 = vmatprep.subr.bf16.mxu0 %v2761_v0 }
  0x3d   :  { %259 = vrot.lane.b32.xlu0 %v2109_v10, %s2764_s17  ;;  %2269 = vmatprep.mubr.msk.f32.mxu0 %vm2762_vm0, %v2763_v1  ;;  %v2105_v12 = vld [vmem:[#allocation4] ss:$0 sm:$0xff] }
  0x3e   :  { %2450 = vmatpush3.bf16.msra.mxu1 %v2875_v8  ;;  %2456 = vmatpush3.bf16.msra.mxu0 %v2875_v8 }
  0x3f   :  { %2451 = vmatprep.subr.bf16.mxu1 %v2761_v0  ;;  %2457 = vmatprep.subr.bf16.mxu0 %v2761_v0 }
  0x42   :  { %2453 = vmatpush3.bf16.msra.mxu1 %v2885_v11  ;;  %2459 = vmatpush3.bf16.msra.mxu0 %v2885_v11 }
  0x43   :  { %2460 = vmatprep.subr.bf16.mxu1 %v2761_v0  ;;  %2466 = vmatprep.subr.bf16.mxu0 %v2761_v0 }
  0x45   :  { %2259 = vmatmul.mubr.f32.vlgmr.msra.gmra.mrb[0].mxu1 %v2763_v1 }
  0x46   :  { %2462 = vmatpush3.bf16.msra.mxu1 %v2875_v8  ;;  %2280 = vmatprep.mubr.msk.f32.mxu1 %vm2762_vm0, %v2763_v1 }
  0x47   :  { %2463 = vmatprep.subr.bf16.mxu1 %v2761_v0 }
  0x4a   :  { %2465 = vmatpush3.bf16.msra.mxu1 %v2885_v11 }
  0x4b   :  { %2472 = vmatprep.subr.bf16.mxu1 %v2761_v0 }
  0xaf   :  { %v2906_v17 = vpop.permute.xlu0 %259 }
 0x10f   :  { %v2249_v13 = vpop.f32.mrb[0].mxu0 }
 0x110   :  { %v161_v14 = vadd.f32 %v2249_v13, %v2105_v12  ;;  %v155_v15 = vpop.f32.mrb[1].mxu0 }
 0x111   :  { %v156_v16 = vadd.f32 %v2105_v12, %v155_v15 }
 0x112   :  { %166 = vst.msk [vmem:[#allocation2 + $0x8] sm:$0xff] %vm164_vm3, %v161_v14 }
 0x113   :  { %165 = vst.msk [vmem:[#allocation2] sm:$0xff] %vm164_vm3, %v156_v16 }
 0x118   :  { %v248_v18 = vpop.f32.mrb[0].mxu1 }
 0x119   :  { %v262_v19 = vadd.f32 %v2906_v17, %v248_v18  ;;  %v2260_v20 = vpop.f32.mrb[1].mxu1 }
 0x11a   :  { %v177_v21 = vld [vmem:[#allocation2] sm:$0x3]  ;;  %v291_v41 = vld [vmem:[#allocation2 + $0x2] sm:$0x3]  ;;  %v399_v61 = vld [vmem:[#allocation2 + $0x4] sm:$0x3] }
 0x11b   :  { %264 = vrot.lane.b32.xlu0 %v262_v19, %s2764_s17  ;;  %v252_v22 = vadd.f32 %v248_v18, %v177_v21 }
 0x11d   :  { %v2110_v23 = vmul.f32 -1.442695, %v252_v22  ;;  %v507_v22 = vld [vmem:[#allocation2 + $0x6] sm:$0x3] }
 0x11f   :  { %2568 = vpow2.f32 %v2110_v23 }
 0x129   :  { %v2569_v24 = vpop.eup %2568 }
 0x12a   :  { %v256_v25 = vadd.f32 1.0, %v2569_v24 }
 0x12c   :  { %2570 = vrcp.f32 %v256_v25 }
 0x136   :  { %v2571_v26 = vpop.eup %2570 }
 0x18d   :  { %v265_v27 = vpop.permute.xlu0 %264 }
 0x18e   :  { %v267_v28 = vmul.f32 %v2571_v26, %v265_v27 }
 0x190   :  { %269 = vrot.lane.b32.xlu1 %v267_v28, %s2764_s17 }
 0x202   :  { %v270_v29 = vpop.permute.xlu1 %269 }
 0x203   :  { %v272_v30 = vadd.f32 %v270_v29, %v177_v21 }
 0x205   :  { %2572 = vtanh.f32 %v272_v30 }
 0x20f   :  { %v2573_v31 = vpop.eup %2572 }
 0x210   :  { %v274_v32 = vsub.f32 0.0, %v2573_v31 }
 0x212   :  { %276 = vrot.lane.b32.xlu1 %v274_v32, %s2765_s18 }
 0x284   :  { %v277_v33 = vpop.permute.xlu1 %276 }
 0x285   :  { %v279_v34 = vmul.f32 %v2571_v26, %v277_v33 }
 0x287   :  { %281 = vrot.lane.b32.xlu0 %v279_v34, %s2766_s19 }
 0x2f9   :  { %v282_v35 = vpop.permute.xlu0 %281 }
 0x2fa   :  { %v284_v36 = vadd.f32 %v2573_v31, %v282_v35 }
 0x2fc   :  { %286 = vrot.lane.b32.xlu1 %v284_v36, %s2764_s17 }
 0x36e   :  { %v287_v37 = vpop.permute.xlu1 %286 }
 0x36f   :  { %290 = vst.msk [vmem:[#allocation3] sm:$0x3] %vm289_vm4, %v287_v37  ;;  %2270 = vmatmul.mubr.msk.f32.vlgmr.msra.gmra.mrb[2].mxu0 %vm178_vm5, %v287_v37 }
 0x370   :  { %2468 = vmatpush3.bf16.msra.mxu0 %v2875_v8  ;;  %2291 = vmatprep.mubr.msk.f32.mxu0 %vm2762_vm0, %v2763_v1 }
 0x371   :  { %2469 = vmatprep.subr.bf16.mxu0 %v2761_v0 }
 0x374   :  { %2471 = vmatpush3.bf16.msra.mxu0 %v2885_v11 }
 0x375   :  { %2478 = vmatprep.subr.bf16.mxu0 %v2761_v0 }
 0x442   :  { %v360_v38 = vpop.f32.mrb[2].mxu0 }
 0x443   :  { %v371_v39 = vadd.f32 %v360_v38, %v2906_v17  ;;  %v2271_v40 = vpop.f32.mrb[3].mxu0  ;;  %v364_v42 = vadd.f32 %v360_v38, %v291_v41 }
 0x445   :  { %373 = vrot.lane.b32.xlu0 %v371_v39, %s2764_s17  ;;  %v2112_v43 = vmul.f32 -1.442695, %v364_v42  ;;  %v615_v42 = vld [vmem:[#allocation2 + $0x8] sm:$0x3] }
 0x447   :  { %2574 = vpow2.f32 %v2112_v43 }
 0x451   :  { %v2575_v44 = vpop.eup %2574 }
 0x452   :  { %v368_v45 = vadd.f32 1.0, %v2575_v44 }
 0x454   :  { %2576 = vrcp.f32 %v368_v45 }
 0x45e   :  { %v2577_v46 = vpop.eup %2576 }
 0x4b7   :  { %v374_v47 = vpop.permute.xlu0 %373 }
 0x4b8   :  { %v376_v48 = vmul.f32 %v2577_v46, %v374_v47 }
 0x4ba   :  { %378 = vrot.lane.b32.xlu1 %v376_v48, %s2764_s17 }
 0x52c   :  { %v379_v49 = vpop.permute.xlu1 %378 }
 0x52d   :  { %v381_v50 = vadd.f32 %v379_v49, %v291_v41 }
 0x52f   :  { %2578 = vtanh.f32 %v381_v50 }
 0x539   :  { %v2579_v51 = vpop.eup %2578 }
 0x53a   :  { %v383_v52 = vsub.f32 %v284_v36, %v2579_v51 }
 0x53c   :  { %385 = vrot.lane.b32.xlu0 %v383_v52, %s2765_s18 }
 0x5ae   :  { %v386_v53 = vpop.permute.xlu0 %385 }
 0x5af   :  { %v388_v54 = vmul.f32 %v2577_v46, %v386_v53 }
 0x5b1   :  { %390 = vrot.lane.b32.xlu1 %v388_v54, %s2766_s19 }
 0x623   :  { %v391_v55 = vpop.permute.xlu1 %390 }
 0x624   :  { %v393_v56 = vadd.f32 %v2579_v51, %v391_v55 }
 0x626   :  { %395 = vrot.lane.b32.xlu0 %v393_v56, %s2764_s17 }
 0x698   :  { %v396_v57 = vpop.permute.xlu0 %395 }
 0x699   :  { %398 = vst.msk [vmem:[#allocation3 + $0x2] sm:$0x3] %vm289_vm4, %v396_v57  ;;  %2281 = vmatmul.mubr.msk.f32.vlgmr.msra.gmra.mrb[2].mxu1 %vm178_vm5, %v396_v57 }
 0x69a   :  { %2474 = vmatpush3.bf16.msra.mxu1 %v2875_v8  ;;  %2302 = vmatprep.mubr.msk.f32.mxu1 %vm2762_vm0, %v2763_v1 }
 0x69b   :  { %2475 = vmatprep.subr.bf16.mxu1 %v2761_v0 }
 0x69e   :  { %2477 = vmatpush3.bf16.msra.mxu1 %v2885_v11 }
 0x69f   :  { %2484 = vmatprep.subr.bf16.mxu1 %v2761_v0 }
 0x76c   :  { %v468_v58 = vpop.f32.mrb[2].mxu1 }
 0x76d   :  { %v479_v59 = vadd.f32 %v468_v58, %v2906_v17  ;;  %v2282_v60 = vpop.f32.mrb[3].mxu1  ;;  %v472_v62 = vadd.f32 %v468_v58, %v399_v61 }
 0x76f   :  { %481 = vrot.lane.b32.xlu1 %v479_v59, %s2764_s17  ;;  %v2114_v63 = vmul.f32 -1.442695, %v472_v62  ;;  %v723_v62 = vld [vmem:[#allocation2 + $0xa] sm:$0x3] }
 0x771   :  { %2580 = vpow2.f32 %v2114_v63 }
 0x77b   :  { %v2581_v2 = vpop.eup %2580 }
 0x77c   :  { %v476_v3 = vadd.f32 1.0, %v2581_v2 }
 0x77e   :  { %2582 = vrcp.f32 %v476_v3 }
 0x788   :  { %v2583_v4 = vpop.eup %2582 }
 0x7e1   :  { %v482_v5 = vpop.permute.xlu1 %481 }
 0x7e2   :  { %v484_v6 = vmul.f32 %v2583_v4, %v482_v5 }
 0x7e4   :  { %486 = vrot.lane.b32.xlu0 %v484_v6, %s2764_s17 }
 0x856   :  { %v487_v7 = vpop.permute.xlu0 %486 }
 0x857   :  { %v489_v9 = vadd.f32 %v487_v7, %v399_v61 }
 0x859   :  { %2584 = vtanh.f32 %v489_v9 }
 0x863   :  { %v2585_v10 = vpop.eup %2584 }
 0x864   :  { %v491_v12 = vsub.f32 %v393_v56, %v2585_v10 }
 0x866   :  { %493 = vrot.lane.b32.xlu1 %v491_v12, %s2765_s18 }
 0x8d8   :  { %v494_v13 = vpop.permute.xlu1 %493 }
 0x8d9   :  { %v496_v14 = vmul.f32 %v2583_v4, %v494_v13 }
 0x8db   :  { %498 = vrot.lane.b32.xlu0 %v496_v14, %s2766_s19 }
 0x94d   :  { %v499_v15 = vpop.permute.xlu0 %498 }
 0x94e   :  { %v501_v16 = vadd.f32 %v2585_v10, %v499_v15 }
 0x950   :  { %503 = vrot.lane.b32.xlu1 %v501_v16, %s2764_s17 }
 0x9c2   :  { %v504_v18 = vpop.permute.xlu1 %503 }
 0x9c3   :  { %506 = vst.msk [vmem:[#allocation3 + $0x4] sm:$0x3] %vm289_vm4, %v504_v18  ;;  %2292 = vmatmul.mubr.msk.f32.vlgmr.msra.gmra.mrb[4].mxu0 %vm178_vm5, %v504_v18 }
 0x9c4   :  { %2480 = vmatpush3.bf16.msra.mxu0 %v2875_v8  ;;  %2313 = vmatprep.mubr.msk.f32.mxu0 %vm2762_vm0, %v2763_v1 }
 0x9c5   :  { %2481 = vmatprep.subr.bf16.mxu0 %v2761_v0 }
 0x9c8   :  { %2483 = vmatpush3.bf16.msra.mxu0 %v2885_v11 }
 0x9c9   :  { %2490 = vmatprep.subr.bf16.mxu0 %v2761_v0 }
 0xa96   :  { %v576_v19 = vpop.f32.mrb[4].mxu0 }
 0xa97   :  { %v587_v20 = vadd.f32 %v576_v19, %v2906_v17  ;;  %v2293_v21 = vpop.f32.mrb[5].mxu0  ;;  %v580_v23 = vadd.f32 %v576_v19, %v507_v22 }
 0xa99   :  { %589 = vrot.lane.b32.xlu0 %v587_v20, %s2764_s17  ;;  %v2116_v24 = vmul.f32 -1.442695, %v580_v23 }
 0xa9b   :  { %2586 = vpow2.f32 %v2116_v24 }
 0xaa5   :  { %v2587_v25 = vpop.eup %2586 }
 0xaa6   :  { %v584_v26 = vadd.f32 1.0, %v2587_v25 }
 0xaa8   :  { %2588 = vrcp.f32 %v584_v26 }
 0xab2   :  { %v2589_v27 = vpop.eup %2588 }
 0xb0b   :  { %v590_v28 = vpop.permute.xlu0 %589 }
 0xb0c   :  { %v592_v29 = vmul.f32 %v2589_v27, %v590_v28 }
 0xb0e   :  { %594 = vrot.lane.b32.xlu1 %v592_v29, %s2764_s17 }
 0xb80   :  { %v595_v30 = vpop.permute.xlu1 %594 }
 0xb81   :  { %v597_v31 = vadd.f32 %v595_v30, %v507_v22  ;;  %v831_v22 = vld [vmem:[#allocation2 + $0xc] sm:$0x3] }
 0xb83   :  { %2590 = vtanh.f32 %v597_v31 }
 0xb8d   :  { %v2591_v32 = vpop.eup %2590 }
 0xb8e   :  { %v599_v33 = vsub.f32 %v501_v16, %v2591_v32 }
 0xb90   :  { %601 = vrot.lane.b32.xlu0 %v599_v33, %s2765_s18 }
 0xc02   :  { %v602_v34 = vpop.permute.xlu0 %601 }
 0xc03   :  { %v604_v35 = vmul.f32 %v2589_v27, %v602_v34 }
 0xc05   :  { %606 = vrot.lane.b32.xlu1 %v604_v35, %s2766_s19 }
 0xc77   :  { %v607_v36 = vpop.permute.xlu1 %606 }
 0xc78   :  { %v609_v37 = vadd.f32 %v2591_v32, %v607_v36 }
 0xc7a   :  { %611 = vrot.lane.b32.xlu0 %v609_v37, %s2764_s17 }
 0xcec   :  { %v612_v38 = vpop.permute.xlu0 %611 }
 0xced   :  { %614 = vst.msk [vmem:[#allocation3 + $0x6] sm:$0x3] %vm289_vm4, %v612_v38  ;;  %2303 = vmatmul.mubr.msk.f32.vlgmr.msra.gmra.mrb[4].mxu1 %vm178_vm5, %v612_v38 }
 0xcee   :  { %2486 = vmatpush3.bf16.msra.mxu1 %v2875_v8  ;;  %2324 = vmatprep.mubr.msk.f32.mxu1 %vm2762_vm0, %v2763_v1 }
 0xcef   :  { %2487 = vmatprep.subr.bf16.mxu1 %v2761_v0 }
 0xcf2   :  { %2489 = vmatpush3.bf16.msra.mxu1 %v2885_v11 }
 0xcf4   :  { %v1047_v18 = vld [vmem:[#allocation3] sm:$0xff] }
 0xdc0   :  { %v684_v39 = vpop.f32.mrb[4].mxu1 }
 0xdc1   :  { %v695_v40 = vadd.f32 %v684_v39, %v2906_v17  ;;  %v2304_v41 = vpop.f32.mrb[5].mxu1  ;;  %v688_v43 = vadd.f32 %v684_v39, %v615_v42 }
 0xdc3   :  { %697 = vrot.lane.b32.xlu1 %v695_v40, %s2764_s17  ;;  %v2118_v44 = vmul.f32 -1.442695, %v688_v43 }
 0xdc5   :  { %2592 = vpow2.f32 %v2118_v44 }
 0xdcf   :  { %v2593_v45 = vpop.eup %2592 }
 0xdd0   :  { %v692_v46 = vadd.f32 1.0, %v2593_v45 }
 0xdd2   :  { %2594 = vrcp.f32 %v692_v46 }
 0xddc   :  { %v2595_v47 = vpop.eup %2594 }
 0xe35   :  { %v698_v48 = vpop.permute.xlu1 %697 }
 0xe36   :  { %v700_v49 = vmul.f32 %v2595_v47, %v698_v48 }
 0xe38   :  { %702 = vrot.lane.b32.xlu0 %v700_v49, %s2764_s17 }
 0xeaa   :  { %v703_v50 = vpop.permute.xlu0 %702 }
 0xeab   :  { %v705_v51 = vadd.f32 %v703_v50, %v615_v42  ;;  %v939_v42 = vld [vmem:[#allocation2 + $0xe] sm:$0x3] }
 0xead   :  { %2596 = vtanh.f32 %v705_v51 }
 0xeb7   :  { %v2597_v52 = vpop.eup %2596 }
 0xeb8   :  { %v707_v53 = vsub.f32 %v609_v37, %v2597_v52 }
 0xeba   :  { %709 = vrot.lane.b32.xlu1 %v707_v53, %s2765_s18  ;;  %v2128_v53 = vld [vmem:[%s3175_s5 + $0x20] sm:$0xff] }
 0xf2c   :  { %v710_v54 = vpop.permute.xlu1 %709 }
 0xf2d   :  { %v712_v55 = vmul.f32 %v2595_v47, %v710_v54  ;;  %v2129_v54 = vld [vmem:[%s3175_s5 + $0x28] sm:$0xff] }
 0xf2f   :  { %714 = vrot.lane.b32.xlu0 %v712_v55, %s2766_s19  ;;  %v2130_v55 = vld [vmem:[%s3175_s5 + $0x30] sm:$0xff] }
 0xfa1   :  { %v715_v56 = vpop.permute.xlu0 %714 }
 0xfa2   :  { %v717_v57 = vadd.f32 %v2597_v52, %v715_v56  ;;  %v3009_v56 = vpack.c.bf16 %v2129_v54, %v2128_v53 }
 0xfa4   :  { %719 = vrot.lane.b32.xlu1 %v717_v57, %s2764_s17 }
0x1016   :  { %v720_v58 = vpop.permute.xlu1 %719 }
0x1017   :  { %722 = vst.msk [vmem:[#allocation3 + $0x8] sm:$0x3] %vm289_vm4, %v720_v58  ;;  %2314 = vmatmul.mubr.msk.f32.vlgmr.msra.gmra.mrb[6].mxu0 %vm178_vm5, %v720_v58 }
0x1018   :  { %2492 = vmatpush3.bf16.msra.mxu0 %v2875_v8  ;;  %2335 = vmatprep.mubr.msk.f32.mxu0 %vm2762_vm0, %v2763_v1 }
0x1019   :  { %2493 = vmatprep.subr.bf16.mxu0 %v2761_v0 }
0x101c   :  { %2495 = vmatpush3.bf16.msra.mxu0 %v2885_v11 }
0x101d   :  { %2504 = vmatprep.subr.bf16.mxu0 %v2761_v0 }
0x10ea   :  { %v792_v59 = vpop.f32.mrb[6].mxu0 }
0x10eb   :  { %v803_v60 = vadd.f32 %v792_v59, %v2906_v17  ;;  %v2315_v61 = vpop.f32.mrb[7].mxu0  ;;  %v796_v63 = vadd.f32 %v792_v59, %v723_v62 }
0x10ec   :  { %v1049_v61 = vld [vmem:[%s3173_s3] sm:$0xff] }
0x10ed   :  { %805 = vrot.lane.b32.xlu0 %v803_v60, %s2764_s17  ;;  %v2120_v2 = vmul.f32 -1.442695, %v796_v63 }
0x10ef   :  { %2598 = vpow2.f32 %v2120_v2  ;;  %v1051_v2 = vld [vmem:[%s3173_s3 + $0x10] sm:$0xff] }
0x10f9   :  { %v2599_v8 = vpop.eup %2598 }
0x10fa   :  { %v800_v3 = vadd.f32 1.0, %v2599_v8  ;;  %v1052_v8 = vld [vmem:[%s3173_s3 + $0x18] sm:$0xff] }
0x10fc   :  { %2600 = vrcp.f32 %v800_v3  ;;  %v2500_v3 = vpack.c.bf16 %v1052_v8, %v1051_v2 }
0x1106   :  { %v2601_v4 = vpop.eup %2600 }
0x115f   :  { %v806_v5 = vpop.permute.xlu0 %805 }
0x1160   :  { %v808_v6 = vmul.f32 %v2601_v4, %v806_v5 }
0x1162   :  { %810 = vrot.lane.b32.xlu1 %v808_v6, %s2764_s17 }
0x11d4   :  { %v811_v11 = vpop.permute.xlu1 %810 }
0x11d5   :  { %v813_v7 = vadd.f32 %v811_v11, %v723_v62  ;;  %v1050_v62 = vld [vmem:[%s3173_s3 + $0x8] sm:$0xff] }
0x11d6   :  { %v2496_v63 = vpack.c.bf16 %v1050_v62, %v1049_v61 }
0x11d7   :  { %2602 = vtanh.f32 %v813_v7 }
0x11d8   :  { %2497 = vmatprep.subr.bf16.mxu1 %v2496_v63 }
0x11e1   :  { %v2603_v9 = vpop.eup %2602 }
0x11e2   :  { %v815_v10 = vsub.f32 %v717_v57, %v2603_v9  ;;  %v2131_v57 = vld [vmem:[%s3175_s5 + $0x38] sm:$0xff] }
0x11e3   :  { %v3015_v58 = vpack.c.bf16 %v2131_v57, %v2130_v55 }
0x11e4   :  { %817 = vrot.lane.b32.xlu0 %v815_v10, %s2765_s18 }
0x1256   :  { %v818_v12 = vpop.permute.xlu0 %817 }
0x1257   :  { %v820_v13 = vmul.f32 %v2601_v4, %v818_v12  ;;  %v2133_v4 = vld [vmem:[%s3176_s6 + $0x1] ss:$0 sm:$0xff] }
0x1259   :  { %822 = vrot.lane.b32.xlu1 %v820_v13, %s2766_s19 }
0x12cb   :  { %v823_v14 = vpop.permute.xlu1 %822 }
0x12cc   :  { %v825_v15 = vadd.f32 %v2603_v9, %v823_v14  ;;  %v2125_v14 = vld [vmem:[#allocation7] ss:$0 sm:$0xff] }
0x12ce   :  { %827 = vrot.lane.b32.xlu0 %v825_v15, %s2764_s17 }
0x1340   :  { %v828_v16 = vpop.permute.xlu0 %827 }
0x1341   :  { %830 = vst.msk [vmem:[#allocation3 + $0xa] sm:$0x3] %vm289_vm4, %v828_v16  ;;  %2325 = vmatmul.mubr.msk.f32.vlgmr.msra.gmra.mrb[6].mxu1 %vm178_vm5, %v828_v16 }
0x1342   :  { %2346 = vmatprep.mubr.msk.f32.mxu1 %vm178_vm5, %v1047_v18  ;;  %2499 = vmatpush3.bf16.msra.mxu1 %v2496_v63 }
0x1343   :  { %2501 = vmatprep.subr.bf16.mxu1 %v2500_v3 }
0x1346   :  { %2503 = vmatpush3.bf16.msra.mxu1 %v2500_v3 }
0x1347   :  { %2510 = vmatprep.subr.bf16.mxu1 %v2761_v0 }
0x1414   :  { %v900_v19 = vpop.f32.mrb[6].mxu1 }
0x1415   :  { %v911_v20 = vadd.f32 %v900_v19, %v2906_v17  ;;  %v2326_v21 = vpop.f32.mrb[7].mxu1  ;;  %v904_v23 = vadd.f32 %v900_v19, %v831_v22 }
0x1417   :  { %913 = vrot.lane.b32.xlu1 %v911_v20, %s2764_s17  ;;  %v2122_v24 = vmul.f32 -1.442695, %v904_v23 }
0x1419   :  { %2604 = vpow2.f32 %v2122_v24 }
0x1423   :  { %v2605_v25 = vpop.eup %2604 }
0x1424   :  { %v908_v26 = vadd.f32 1.0, %v2605_v25 }
0x1426   :  { %2606 = vrcp.f32 %v908_v26 }
0x1430   :  { %v2607_v27 = vpop.eup %2606 }
0x1489   :  { %v914_v28 = vpop.permute.xlu1 %913 }
0x148a   :  { %v916_v29 = vmul.f32 %v2607_v27, %v914_v28 }
0x148c   :  { %918 = vrot.lane.b32.xlu0 %v916_v29, %s2764_s17 }
0x14fe   :  { %v919_v30 = vpop.permute.xlu0 %918 }
0x14ff   :  { %v921_v31 = vadd.f32 %v919_v30, %v831_v22 }
0x1501   :  { %2608 = vtanh.f32 %v921_v31 }
0x150b   :  { %v2609_v32 = vpop.eup %2608 }
0x150c   :  { %v923_v33 = vsub.f32 %v825_v15, %v2609_v32 }
0x150e   :  { %925 = vrot.lane.b32.xlu1 %v923_v33, %s2765_s18 }
0x1580   :  { %v926_v34 = vpop.permute.xlu1 %925 }
0x1581   :  { %v928_v35 = vmul.f32 %v2607_v27, %v926_v34 }
0x1583   :  { %930 = vrot.lane.b32.xlu0 %v928_v35, %s2766_s19 }
0x15f5   :  { %v931_v36 = vpop.permute.xlu0 %930 }
0x15f6   :  { %v933_v37 = vadd.f32 %v2609_v32, %v931_v36 }
0x15f8   :  { %935 = vrot.lane.b32.xlu1 %v933_v37, %s2764_s17 }
0x166a   :  { %v936_v38 = vpop.permute.xlu1 %935 }
0x166b   :  { %938 = vst.msk [vmem:[#allocation3 + $0xc] sm:$0x3] %vm289_vm4, %v936_v38  ;;  %2336 = vmatmul.mubr.msk.f32.vlgmr.msra.gmra.mrb[8].mxu0 %vm178_vm5, %v936_v38 }
0x166c   :  { %2357 = vmatprep.mubr.msk.f32.mxu0 %vm2762_vm0, %v2763_v1  ;;  %2506 = vmatpush3.bf16.msra.mxu0 %v3009_v56 }
0x166d   :  { %2507 = vmatprep.subr.bf16.mxu0 %v2761_v0 }
0x1670   :  { %2509 = vmatpush3.bf16.msra.mxu0 %v3015_v58 }
0x1671   :  { %2516 = vmatprep.subr.bf16.mxu0 %v2761_v0 }
0x1673   :  { %2358 = vmatmul.mubr.f32.vlgmr.msra.gmra.mrb[10].mxu0 %v2763_v1 }
0x1674   :  { %2518 = vmatpush3.bf16.msra.mxu0 %v3009_v56  ;;  %2379 = vmatprep.mubr.msk.f32.mxu0 %vm2762_vm0, %v2763_v1 }
0x1675   :  { %2519 = vmatprep.subr.bf16.mxu0 %v2761_v0 }
0x1678   :  { %2521 = vmatpush3.bf16.msra.mxu0 %v3015_v58 }
0x1679   :  { %2528 = vmatprep.subr.bf16.mxu0 %v2761_v0 }
0x173e   :  { %v1008_v39 = vpop.f32.mrb[8].mxu0 }
0x173f   :  { %v1019_v40 = vadd.f32 %v1008_v39, %v2906_v17  ;;  %v2337_v41 = vpop.f32.mrb[9].mxu0  ;;  %v1012_v43 = vadd.f32 %v1008_v39, %v939_v42 }
0x1741   :  { %1021 = vrot.lane.b32.xlu0 %v1019_v40, %s2764_s17  ;;  %v2124_v44 = vmul.f32 -1.442695, %v1012_v43 }
0x1743   :  { %2610 = vpow2.f32 %v2124_v44 }
0x1746   :  { %v1222_v11 = vpop.f32.mrb[10].mxu0 }
0x1747   :  { %v2359_v7 = vpop.f32.mrb[11].mxu0 }
0x174d   :  { %v2611_v45 = vpop.eup %2610 }
0x174e   :  { %v1016_v46 = vadd.f32 1.0, %v2611_v45 }
0x1750   :  { %2612 = vrcp.f32 %v1016_v46 }
0x175a   :  { %v2613_v47 = vpop.eup %2612 }
0x17b3   :  { %v1022_v48 = vpop.permute.xlu0 %1021 }
0x17b4   :  { %v1024_v49 = vmul.f32 %v2613_v47, %v1022_v48 }
0x17b6   :  { %1026 = vrot.lane.b32.xlu1 %v1024_v49, %s2764_s17 }
0x1828   :  { %v1027_v50 = vpop.permute.xlu1 %1026 }
0x1829   :  { %v1029_v51 = vadd.f32 %v1027_v50, %v939_v42 }
0x182b   :  { %2614 = vtanh.f32 %v1029_v51 }
0x1835   :  { %v2615_v52 = vpop.eup %2614 }
0x1836   :  { %v1031_v17 = vsub.f32 %v933_v37, %v2615_v52 }
0x1838   :  { %1033 = vrot.lane.b32.xlu0 %v1031_v17, %s2765_s18 }
0x18aa   :  { %v1034_v59 = vpop.permute.xlu0 %1033 }
0x18ab   :  { %v1036_v60 = vmul.f32 %v2613_v47, %v1034_v59 }
0x18ad   :  { %1038 = vrot.lane.b32.xlu1 %v1036_v60, %s2766_s19 }
0x18b1   :  { %1233 = vrot.lane.b32.xlu1 %v2133_v4, %s2764_s17 }
0x191f   :  { %v1039_v5 = vpop.permute.xlu1 %1038 }
0x1920   :  { %v1041_v6 = vadd.f32 %v2615_v52, %v1039_v5 }
0x1922   :  { %1043 = vrot.lane.b32.xlu0 %v1041_v6, %s2764_s17 }
0x1923   :  { %v3046_v9 = vpop.permute.xlu1 %1233 }
0x1924   :  { %v1236_v10 = vadd.f32 %v3046_v9, %v1222_v11 }
0x1926   :  { %1238 = vrot.lane.b32.xlu0 %v1236_v10, %s2764_s17 }
0x1994   :  { %v1044_v12 = vpop.permute.xlu0 %1043 }
0x1995   :  { %1046 = vst.msk [vmem:[#allocation3 + $0xe] sm:$0x3] %vm289_vm4, %v1044_v12 }
0x1998   :  { %v1239_v25 = vpop.permute.xlu0 %1238 }
0x199c   :  { %v1048_v13 = vld [vmem:[#allocation3 + $0x8] sm:$0xff] }
0x199d   :  { %2347 = vmatmul.mubr.msk.f32.vlgmr.msra.gmra.mrb[8].mxu1 %vm178_vm5, %v1048_v13 }
0x199e   :  { %2512 = vmatpush3.bf16.msra.mxu1 %v3009_v56  ;;  %2368 = vmatprep.mubr.msk.f32.mxu1 %vm2762_vm0, %v2763_v1 }
0x199f   :  { %2513 = vmatprep.subr.bf16.mxu1 %v2761_v0 }
0x19a2   :  { %2515 = vmatpush3.bf16.msra.mxu1 %v3015_v58 }
0x19a3   :  { %2522 = vmatprep.subr.bf16.mxu1 %v2761_v0 }
0x1a70   :  { %v2348_v15 = vpop.f32.mrb[8].mxu1 }
0x1a71   :  { %v1138_v16 = vadd.f32 %v2348_v15, %v2125_v14  ;;  %v1132_v18 = vpop.f32.mrb[9].mxu1 }
0x1a72   :  { %v1133_v19 = vadd.f32 %v2125_v14, %v1132_v18 }
0x1a73   :  { %1142 = vst.msk [vmem:[#allocation2 + $0x8] sm:$0xff] %vm164_vm3, %v1138_v16 }
0x1a74   :  { %1141 = vst.msk [vmem:[#allocation2] sm:$0xff] %vm164_vm3, %v1133_v19 }
0x1a7b   :  { %v1155_v20 = vld [vmem:[#allocation2] sm:$0x3]  ;;  %v1259_v40 = vld [vmem:[#allocation2 + $0x2] sm:$0x3]  ;;  %v1365_v61 = vld [vmem:[#allocation2 + $0x4] sm:$0x3] }
0x1a7c   :  { %v1226_v21 = vadd.f32 %v1222_v11, %v1155_v20 }
0x1a7e   :  { %v2134_v22 = vmul.f32 -1.442695, %v1226_v21  ;;  %v1471_v21 = vld [vmem:[#allocation2 + $0x6] sm:$0x3] }
0x1a80   :  { %2616 = vpow2.f32 %v2134_v22 }
0x1a8a   :  { %v2617_v23 = vpop.eup %2616 }
0x1a8b   :  { %v1230_v24 = vadd.f32 1.0, %v2617_v23 }
0x1a8d   :  { %2618 = vrcp.f32 %v1230_v24 }
0x1a97   :  { %v2619_v26 = vpop.eup %2618 }
0x1a98   :  { %v1241_v27 = vmul.f32 %v2619_v26, %v1239_v25 }
0x1a9a   :  { %1243 = vrot.lane.b32.xlu1 %v1241_v27, %s2764_s17 }
0x1b0c   :  { %v1244_v28 = vpop.permute.xlu1 %1243 }
0x1b0d   :  { %v1246_v29 = vadd.f32 %v1244_v28, %v1155_v20 }
0x1b0f   :  { %2620 = vtanh.f32 %v1246_v29 }
0x1b19   :  { %v2621_v30 = vpop.eup %2620 }
0x1b1a   :  { %v1248_v31 = vsub.f32 0.0, %v2621_v30 }
0x1b1c   :  { %1250 = vrot.lane.b32.xlu0 %v1248_v31, %s2765_s18 }
0x1b8e   :  { %v1251_v32 = vpop.permute.xlu0 %1250 }
0x1b8f   :  { %v1253_v33 = vmul.f32 %v2619_v26, %v1251_v32 }
0x1b91   :  { %1255 = vrot.lane.b32.xlu1 %v1253_v33, %s2766_s19 }
0x1c03   :  { %v1256_v34 = vpop.permute.xlu1 %1255 }
0x1c04   :  { %v1258_v35 = vadd.f32 %v2621_v30, %v1256_v34 }
0x1c06   :  { %1261 = vrot.lane.b32.xlu0 %v1258_v35, %s2764_s17 }
0x1c78   :  { %v1262_v36 = vpop.permute.xlu0 %1261 }
0x1c79   :  { %2369 = vmatmul.mubr.msk.f32.vlgmr.msra.gmra.mrb[10].mxu1 %vm178_vm5, %v1262_v36 }
0x1c7a   :  { %2524 = vmatpush3.bf16.msra.mxu1 %v3009_v56  ;;  %2390 = vmatprep.mubr.msk.f32.mxu1 %vm2762_vm0, %v2763_v1 }
0x1c7b   :  { %2525 = vmatprep.subr.bf16.mxu1 %v2761_v0 }
0x1c7e   :  { %2527 = vmatpush3.bf16.msra.mxu1 %v3015_v58 }
0x1c7f   :  { %2534 = vmatprep.subr.bf16.mxu1 %v2761_v0 }
0x1d4c   :  { %v1331_v37 = vpop.f32.mrb[10].mxu1 }
0x1d4d   :  { %v1342_v38 = vadd.f32 %v1331_v37, %v3046_v9  ;;  %v2370_v39 = vpop.f32.mrb[11].mxu1  ;;  %v1335_v41 = vadd.f32 %v1331_v37, %v1259_v40 }
0x1d4f   :  { %1344 = vrot.lane.b32.xlu1 %v1342_v38, %s2764_s17  ;;  %v2136_v42 = vmul.f32 -1.442695, %v1335_v41  ;;  %v1577_v41 = vld [vmem:[#allocation2 + $0x8] sm:$0x3] }
0x1d51   :  { %2622 = vpow2.f32 %v2136_v42 }
0x1d5b   :  { %v2623_v43 = vpop.eup %2622 }
0x1d5c   :  { %v1339_v44 = vadd.f32 1.0, %v2623_v43 }
0x1d5e   :  { %2624 = vrcp.f32 %v1339_v44 }
0x1d68   :  { %v2625_v45 = vpop.eup %2624 }
0x1dc1   :  { %v1345_v46 = vpop.permute.xlu1 %1344 }
0x1dc2   :  { %v1347_v47 = vmul.f32 %v2625_v45, %v1345_v46 }
0x1dc4   :  { %1349 = vrot.lane.b32.xlu0 %v1347_v47, %s2764_s17 }
0x1e36   :  { %v1350_v48 = vpop.permute.xlu0 %1349 }
0x1e37   :  { %v1352_v49 = vadd.f32 %v1350_v48, %v1259_v40 }
0x1e39   :  { %2626 = vtanh.f32 %v1352_v49 }
0x1e43   :  { %v2627_v50 = vpop.eup %2626 }
0x1e44   :  { %v1354_v51 = vsub.f32 %v1258_v35, %v2627_v50 }
0x1e46   :  { %1356 = vrot.lane.b32.xlu1 %v1354_v51, %s2765_s18 }
0x1eb8   :  { %v1357_v52 = vpop.permute.xlu1 %1356 }
0x1eb9   :  { %v1359_v17 = vmul.f32 %v2625_v45, %v1357_v52 }
0x1ebb   :  { %1361 = vrot.lane.b32.xlu0 %v1359_v17, %s2766_s19 }
0x1f2d   :  { %v1362_v53 = vpop.permute.xlu0 %1361 }
0x1f2e   :  { %v1364_v54 = vadd.f32 %v2627_v50, %v1362_v53 }
0x1f30   :  { %1367 = vrot.lane.b32.xlu1 %v1364_v54, %s2764_s17 }
0x1fa2   :  { %v1368_v55 = vpop.permute.xlu1 %1367 }
0x1fa3   :  { %2380 = vmatmul.mubr.msk.f32.vlgmr.msra.gmra.mrb[12].mxu0 %vm178_vm5, %v1368_v55 }
0x1fa4   :  { %2530 = vmatpush3.bf16.msra.mxu0 %v3009_v56  ;;  %2401 = vmatprep.mubr.msk.f32.mxu0 %vm2762_vm0, %v2763_v1 }
0x1fa5   :  { %2531 = vmatprep.subr.bf16.mxu0 %v2761_v0 }
0x1fa8   :  { %2533 = vmatpush3.bf16.msra.mxu0 %v3015_v58 }
0x1fa9   :  { %2540 = vmatprep.subr.bf16.mxu0 %v2761_v0 }
0x2076   :  { %v1437_v57 = vpop.f32.mrb[12].mxu0 }
0x2077   :  { %v1448_v59 = vadd.f32 %v1437_v57, %v3046_v9  ;;  %v2381_v60 = vpop.f32.mrb[13].mxu0  ;;  %v1441_v62 = vadd.f32 %v1437_v57, %v1365_v61 }
0x2079   :  { %1450 = vrot.lane.b32.xlu0 %v1448_v59, %s2764_s17  ;;  %v2138_v63 = vmul.f32 -1.442695, %v1441_v62  ;;  %v1683_v62 = vld [vmem:[#allocation2 + $0xa] sm:$0x3] }
0x207b   :  { %2628 = vpow2.f32 %v2138_v63 }
0x2085   :  { %v2629_v2 = vpop.eup %2628 }
0x2086   :  { %v1445_v8 = vadd.f32 1.0, %v2629_v2 }
0x2088   :  { %2630 = vrcp.f32 %v1445_v8 }
0x2092   :  { %v2631_v3 = vpop.eup %2630 }
0x20eb   :  { %v1451_v4 = vpop.permute.xlu0 %1450 }
0x20ec   :  { %v1453_v5 = vmul.f32 %v2631_v3, %v1451_v4 }
0x20ee   :  { %1455 = vrot.lane.b32.xlu1 %v1453_v5, %s2764_s17 }
0x2160   :  { %v1456_v6 = vpop.permute.xlu1 %1455 }
0x2161   :  { %v1458_v11 = vadd.f32 %v1456_v6, %v1365_v61 }
0x2163   :  { %2632 = vtanh.f32 %v1458_v11 }
0x216d   :  { %v2633_v7 = vpop.eup %2632 }
0x216e   :  { %v1460_v10 = vsub.f32 %v1364_v54, %v2633_v7 }
0x2170   :  { %1462 = vrot.lane.b32.xlu0 %v1460_v10, %s2765_s18 }
0x21e2   :  { %v1463_v12 = vpop.permute.xlu0 %1462 }
0x21e3   :  { %v1465_v13 = vmul.f32 %v2631_v3, %v1463_v12 }
0x21e5   :  { %1467 = vrot.lane.b32.xlu1 %v1465_v13, %s2766_s19 }
0x2257   :  { %v1468_v14 = vpop.permute.xlu1 %1467 }
0x2258   :  { %v1470_v15 = vadd.f32 %v2633_v7, %v1468_v14 }
0x225a   :  { %1473 = vrot.lane.b32.xlu0 %v1470_v15, %s2764_s17 }
0x22cc   :  { %v1474_v16 = vpop.permute.xlu0 %1473 }
0x22cd   :  { %2391 = vmatmul.mubr.msk.f32.vlgmr.msra.gmra.mrb[12].mxu1 %vm178_vm5, %v1474_v16 }
0x22ce   :  { %2536 = vmatpush3.bf16.msra.mxu1 %v3009_v56  ;;  %2412 = vmatprep.mubr.msk.f32.mxu1 %vm2762_vm0, %v2763_v1 }
0x22cf   :  { %2537 = vmatprep.subr.bf16.mxu1 %v2761_v0 }
0x22d2   :  { %2539 = vmatpush3.bf16.msra.mxu1 %v3015_v58 }
0x22d3   :  { %2546 = vmatprep.subr.bf16.mxu1 %v2761_v0 }
0x23a0   :  { %v1543_v18 = vpop.f32.mrb[12].mxu1 }
0x23a1   :  { %v1554_v19 = vadd.f32 %v1543_v18, %v3046_v9  ;;  %v2392_v20 = vpop.f32.mrb[13].mxu1  ;;  %v1547_v22 = vadd.f32 %v1543_v18, %v1471_v21 }
0x23a2   :  { %v1789_v20 = vld [vmem:[#allocation2 + $0xc] sm:$0x3] }
0x23a3   :  { %1556 = vrot.lane.b32.xlu1 %v1554_v19, %s2764_s17  ;;  %v2140_v23 = vmul.f32 -1.442695, %v1547_v22 }
0x23a5   :  { %2634 = vpow2.f32 %v2140_v23 }
0x23af   :  { %v2635_v24 = vpop.eup %2634 }
0x23b0   :  { %v1551_v25 = vadd.f32 1.0, %v2635_v24 }
0x23b2   :  { %2636 = vrcp.f32 %v1551_v25 }
0x23bc   :  { %v2637_v26 = vpop.eup %2636 }
0x2415   :  { %v1557_v27 = vpop.permute.xlu1 %1556 }
0x2416   :  { %v1559_v28 = vmul.f32 %v2637_v26, %v1557_v27 }
0x2418   :  { %1561 = vrot.lane.b32.xlu0 %v1559_v28, %s2764_s17 }
0x248a   :  { %v1562_v29 = vpop.permute.xlu0 %1561 }
0x248b   :  { %v1564_v30 = vadd.f32 %v1562_v29, %v1471_v21 }
0x248d   :  { %2638 = vtanh.f32 %v1564_v30 }
0x2497   :  { %v2639_v31 = vpop.eup %2638 }
0x2498   :  { %v1566_v32 = vsub.f32 %v1470_v15, %v2639_v31 }
0x249a   :  { %1568 = vrot.lane.b32.xlu1 %v1566_v32, %s2765_s18 }
0x250c   :  { %v1569_v33 = vpop.permute.xlu1 %1568 }
0x250d   :  { %v1571_v34 = vmul.f32 %v2637_v26, %v1569_v33 }
0x250f   :  { %1573 = vrot.lane.b32.xlu0 %v1571_v34, %s2766_s19 }
0x2581   :  { %v1574_v35 = vpop.permute.xlu0 %1573 }
0x2582   :  { %v1576_v36 = vadd.f32 %v2639_v31, %v1574_v35 }
0x2584   :  { %1579 = vrot.lane.b32.xlu1 %v1576_v36, %s2764_s17 }
0x25f6   :  { %v1580_v37 = vpop.permute.xlu1 %1579 }
0x25f7   :  { %2402 = vmatmul.mubr.msk.f32.vlgmr.msra.gmra.mrb[14].mxu0 %vm178_vm5, %v1580_v37 }
0x25f8   :  { %2542 = vmatpush3.bf16.msra.mxu0 %v3009_v56  ;;  %2423 = vmatprep.mubr.msk.f32.mxu0 %vm2762_vm0, %v2763_v1 }
0x25f9   :  { %2543 = vmatprep.subr.bf16.mxu0 %v2761_v0 }
0x25fc   :  { %2545 = vmatpush3.bf16.msra.mxu0 %v3015_v58 }
0x25fd   :  { %2552 = vmatprep.subr.bf16.mxu0 %v2761_v0 }
0x26ca   :  { %v1649_v38 = vpop.f32.mrb[14].mxu0 }
0x26cb   :  { %v1660_v39 = vadd.f32 %v1649_v38, %v3046_v9  ;;  %v2403_v40 = vpop.f32.mrb[15].mxu0  ;;  %v1653_v42 = vadd.f32 %v1649_v38, %v1577_v41 }
0x26cd   :  { %1662 = vrot.lane.b32.xlu0 %v1660_v39, %s2764_s17  ;;  %v2142_v43 = vmul.f32 -1.442695, %v1653_v42  ;;  %v1895_v39 = vld [vmem:[#allocation2 + $0xe] sm:$0x3] }
0x26cf   :  { %2640 = vpow2.f32 %v2142_v43 }
0x26d9   :  { %v2641_v44 = vpop.eup %2640 }
0x26da   :  { %v1657_v45 = vadd.f32 1.0, %v2641_v44 }
0x26dc   :  { %2642 = vrcp.f32 %v1657_v45 }
0x26e6   :  { %v2643_v46 = vpop.eup %2642 }
0x273f   :  { %v1663_v47 = vpop.permute.xlu0 %1662 }
0x2740   :  { %v1665_v48 = vmul.f32 %v2643_v46, %v1663_v47 }
0x2742   :  { %1667 = vrot.lane.b32.xlu1 %v1665_v48, %s2764_s17 }
0x27b4   :  { %v1668_v49 = vpop.permute.xlu1 %1667 }
0x27b5   :  { %v1670_v50 = vadd.f32 %v1668_v49, %v1577_v41 }
0x27b7   :  { %2644 = vtanh.f32 %v1670_v50  ;;  %v2001_v50 = vld [vmem:[%s3177_s7] sm:$0xff] }
0x27c1   :  { %v2645_v51 = vpop.eup %2644 }
0x27c2   :  { %v1672_v52 = vsub.f32 %v1576_v36, %v2645_v51 }
0x27c4   :  { %1674 = vrot.lane.b32.xlu0 %v1672_v52, %s2765_s18  ;;  %v2003_v52 = vld [vmem:[%s3177_s7 + $0x10] sm:$0xff] }
0x2836   :  { %v1675_v17 = vpop.permute.xlu0 %1674 }
0x2837   :  { %v1677_v53 = vmul.f32 %v2643_v46, %v1675_v17 }
0x2839   :  { %1679 = vrot.lane.b32.xlu1 %v1677_v53, %s2766_s19  ;;  %v2004_v53 = vld [vmem:[%s3177_s7 + $0x18] sm:$0xff] }
0x28ab   :  { %v1680_v54 = vpop.permute.xlu1 %1679 }
0x28ac   :  { %v1682_v55 = vadd.f32 %v2645_v51, %v1680_v54  ;;  %v2002_v51 = vld [vmem:[%s3177_s7 + $0x8] sm:$0xff]  ;;  %v2556_v54 = vpack.c.bf16 %v2004_v53, %v2003_v52 }
0x28ad   :  { %v2553_v17 = vpack.c.bf16 %v2002_v51, %v2001_v50 }
0x28ae   :  { %1685 = vrot.lane.b32.xlu0 %v1682_v55, %s2764_s17 }
0x2920   :  { %v1686_v57 = vpop.permute.xlu0 %1685 }
0x2921   :  { %2413 = vmatmul.mubr.msk.f32.vlgmr.msra.gmra.mrb[14].mxu1 %vm178_vm5, %v1686_v57 }
0x2922   :  { %2548 = vmatpush3.bf16.msra.mxu1 %v3009_v56  ;;  %2434 = vmatprep.mubr.msk.f32.mxu1 %vm2762_vm0, %v2763_v1 }
0x2923   :  { %2549 = vmatprep.subr.bf16.mxu1 %v2761_v0 }
0x2926   :  { %2551 = vmatpush3.bf16.msra.mxu1 %v3015_v58 }
0x29f4   :  { %v1755_v59 = vpop.f32.mrb[14].mxu1 }
0x29f5   :  { %v1766_v60 = vadd.f32 %v1755_v59, %v3046_v9  ;;  %v2414_v61 = vpop.f32.mrb[15].mxu1  ;;  %v1759_v63 = vadd.f32 %v1755_v59, %v1683_v62 }
0x29f7   :  { %1768 = vrot.lane.b32.xlu1 %v1766_v60, %s2764_s17  ;;  %v2144_v2 = vmul.f32 -1.442695, %v1759_v63 }
0x29f9   :  { %2646 = vpow2.f32 %v2144_v2 }
0x2a03   :  { %v2647_v8 = vpop.eup %2646 }
0x2a04   :  { %v1763_v3 = vadd.f32 1.0, %v2647_v8 }
0x2a06   :  { %2648 = vrcp.f32 %v1763_v3 }
0x2a10   :  { %v2649_v56 = vpop.eup %2648 }
0x2a69   :  { %v1769_v4 = vpop.permute.xlu1 %1768 }
0x2a6a   :  { %v1771_v5 = vmul.f32 %v2649_v56, %v1769_v4 }
0x2a6c   :  { %1773 = vrot.lane.b32.xlu0 %v1771_v5, %s2764_s17 }
0x2ade   :  { %v1774_v6 = vpop.permute.xlu0 %1773 }
0x2adf   :  { %v1776_v58 = vadd.f32 %v1774_v6, %v1683_v62  ;;  %v2149_v62 = vld [vmem:[#allocation9] ss:$0 sm:$0xff] }
0x2ae1   :  { %2650 = vtanh.f32 %v1776_v58 }
0x2aeb   :  { %v2651_v11 = vpop.eup %2650 }
0x2aec   :  { %v1778_v7 = vsub.f32 %v1682_v55, %v2651_v11 }
0x2aee   :  { %1780 = vrot.lane.b32.xlu1 %v1778_v7, %s2765_s18 }
0x2b60   :  { %v1781_v10 = vpop.permute.xlu1 %1780 }
0x2b61   :  { %v1783_v12 = vmul.f32 %v2649_v56, %v1781_v10 }
0x2b63   :  { %1785 = vrot.lane.b32.xlu0 %v1783_v12, %s2766_s19 }
0x2bd5   :  { %v1786_v13 = vpop.permute.xlu0 %1785 }
0x2bd6   :  { %v1788_v14 = vadd.f32 %v2651_v11, %v1786_v13 }
0x2bd8   :  { %1791 = vrot.lane.b32.xlu1 %v1788_v14, %s2764_s17 }
0x2c4a   :  { %v1792_v15 = vpop.permute.xlu1 %1791 }
0x2c4b   :  { %2424 = vmatmul.mubr.msk.f32.vlgmr.msra.gmra.mrb[16].mxu0 %vm178_vm5, %v1792_v15 }
0x2c4c   :  { %2445 = vmatprep.mubr.msk.f32.mxu0 %vm2762_vm0, %v2763_v1  ;;  %2554 = vmatpush3.bf16.msra.mxu0 %v2553_v17 }
0x2c4d   :  { %2555 = vmatprep.subr.bf16.mxu0 %v2761_v0 }
0x2c50   :  { %2557 = vmatpush3.bf16.msra.mxu0 %v2556_v54 }
0x2d1e   :  { %v1861_v16 = vpop.f32.mrb[16].mxu0 }
0x2d1f   :  { %v1872_v18 = vadd.f32 %v1861_v16, %v3046_v9  ;;  %v2425_v19 = vpop.f32.mrb[17].mxu0  ;;  %v1865_v21 = vadd.f32 %v1861_v16, %v1789_v20 }
0x2d21   :  { %1874 = vrot.lane.b32.xlu0 %v1872_v18, %s2764_s17  ;;  %v2146_v22 = vmul.f32 -1.442695, %v1865_v21 }
0x2d23   :  { %2652 = vpow2.f32 %v2146_v22 }
0x2d2d   :  { %v2653_v23 = vpop.eup %2652 }
0x2d2e   :  { %v1869_v24 = vadd.f32 1.0, %v2653_v23 }
0x2d30   :  { %2654 = vrcp.f32 %v1869_v24 }
0x2d3a   :  { %v2655_v25 = vpop.eup %2654 }
0x2d93   :  { %v1875_v26 = vpop.permute.xlu0 %1874 }
0x2d94   :  { %v1877_v27 = vmul.f32 %v2655_v25, %v1875_v26 }
0x2d96   :  { %1879 = vrot.lane.b32.xlu1 %v1877_v27, %s2764_s17 }
0x2e08   :  { %v1880_v28 = vpop.permute.xlu1 %1879 }
0x2e09   :  { %v1882_v1 = vadd.f32 %v1880_v28, %v1789_v20 }
0x2e0b   :  { %2656 = vtanh.f32 %v1882_v1 }
0x2e15   :  { %v2657_v29 = vpop.eup %2656 }
0x2e16   :  { %v1884_v30 = vsub.f32 %v1788_v14, %v2657_v29 }
0x2e18   :  { %1886 = vrot.lane.b32.xlu0 %v1884_v30, %s2765_s18 }
0x2e8a   :  { %v1887_v31 = vpop.permute.xlu0 %1886 }
0x2e8b   :  { %v1889_v32 = vmul.f32 %v2655_v25, %v1887_v31 }
0x2e8d   :  { %1891 = vrot.lane.b32.xlu1 %v1889_v32, %s2766_s19 }
0x2eff   :  { %v1892_v33 = vpop.permute.xlu1 %1891 }
0x2f00   :  { %v1894_v34 = vadd.f32 %v2657_v29, %v1892_v33 }
0x2f02   :  { %1897 = vrot.lane.b32.xlu0 %v1894_v34, %s2764_s17 }
0x2f74   :  { %v1898_v35 = vpop.permute.xlu0 %1897 }
0x2f75   :  { %2435 = vmatmul.mubr.msk.f32.vlgmr.msra.gmra.mrb[16].mxu1 %vm178_vm5, %v1898_v35 }
0x3048   :  { %v1967_v36 = vpop.f32.mrb[16].mxu1 }
0x3049   :  { %v1978_v37 = vadd.f32 %v1967_v36, %v3046_v9  ;;  %v2436_v38 = vpop.f32.mrb[17].mxu1  ;;  %v1971_v40 = vadd.f32 %v1967_v36, %v1895_v39 }
0x304b   :  { %1980 = vrot.lane.b32.xlu1 %v1978_v37, %s2764_s17  ;;  %v2148_v41 = vmul.f32 -1.442695, %v1971_v40 }
0x304d   :  { %2658 = vpow2.f32 %v2148_v41 }
0x3057   :  { %v2659_v42 = vpop.eup %2658 }
0x3058   :  { %v1975_v43 = vadd.f32 1.0, %v2659_v42 }
0x305a   :  { %2660 = vrcp.f32 %v1975_v43 }
0x3064   :  { %v2661_v44 = vpop.eup %2660 }
0x30bd   :  { %v1981_v45 = vpop.permute.xlu1 %1980 }
0x30be   :  { %v1983_v46 = vmul.f32 %v2661_v44, %v1981_v45 }
0x30c0   :  { %1985 = vrot.lane.b32.xlu0 %v1983_v46, %s2764_s17 }
0x3132   :  { %v1986_v47 = vpop.permute.xlu0 %1985 }
0x3133   :  { %v1988_v48 = vadd.f32 %v1986_v47, %v1895_v39 }
0x3135   :  { %2662 = vtanh.f32 %v1988_v48 }
0x313f   :  { %v2663_v49 = vpop.eup %2662 }
0x3140   :  { %v1990_v9 = vsub.f32 %v1894_v34, %v2663_v49 }
0x3142   :  { %1992 = vrot.lane.b32.xlu1 %v1990_v9, %s2765_s18  ;;  %s2767_s18 = smov [#allocation10]  }
0x3143   :  { %s2095_s20 = sshll.u32 %s2767_s18, 4  ;;  %s2096_s20 = int_to_ptr.vmem [resolvable:$true] %s2095_s20 }
0x3144   :  { %s2730_s7 = scalar_lea.vmem %s2096_s20, 32  ;;  %p2735_p11 = scmp.lt.s32.totalorder %s2096_s20, %s2096_s20 }
0x3145   :  { %p2731_p10 = scmp.ne.s32.totalorder %s2096_s20, %s2730_s7  ;;  %p2736_p12 = scmp.lt.s32.totalorder %s2730_s7, %s2730_s7 }
0x3147   :  { %p2737_p13 = por %p2736_p12, %p2735_p11 }
0x3149   :  { %p2738_p0 = pnand %p2737_p13, %p2731_p10 }
0x31b4   :  { %v1993_v55 = vpop.permute.xlu1 %1992 }
0x31b5   :  { %v1995_v57 = vmul.f32 %v2661_v44, %v1993_v55 }
0x31b7   :  { %1997 = vrot.lane.b32.xlu0 %v1995_v57, %s2766_s19 }
0x3229   :  { %v1998_v59 = vpop.permute.xlu0 %1997 }
0x322a   :  { %v2000_v60 = vadd.f32 %v2663_v49, %v1998_v59 }
0x322c   :  { %2013 = vrot.lane.b32.xlu1 %v2000_v60, %s2764_s17 }
0x329e   :  { %v2014_v61 = vpop.permute.xlu1 %2013 }
0x329f   :  { %2446 = vmatmul.mubr.msk.f32.vlgmr.msra.gmra.mrb[18].mxu0 %vm178_vm5, %v2014_v61 }
0x3372   :  { %v2083_v63 = vpop.f32.mrb[18].mxu0 }
0x3373   :  { %v2084_v2 = vadd.f32 %v2149_v62, %v2083_v63  ;;  %v2447_v8 = vpop.f32.mrb[19].mxu0 }
0x3375   :  { %2088 = vst.msk [vmem:[#allocation10] sm:$0x3] %vm2087_vm6, %v2084_v2 }
0x3376   :  { %2741 = shalt.err (!%p2738_p0)
}
0x3377   :  { %s2742_s21 = scalar_lea.hbm %s3179_s9, 32 }
0x3378   :  { %p2743_p1 = scmp.ne.s32.totalorder %s3179_s9, %s2742_s21  ;;  %p2746_p2 = scmp.lt.u32.totalorder %s2742_s21, %s3179_s9 }
0x337a   :  { %p2748_p3 = pnand %p2746_p2, %p2743_p1 }
0x337c   :  { %2751 = shalt.err (!%p2748_p3)
}
0x337d   :  { %2098 = dma.vmem_to_hbm [thread:$0]  %s2096_s20, 32, %s3179_s9, [#allocation6]  }
0x337e   :  { %2756 = dma.done.wait [#allocation6], 32  }
0x337f   :  { %2757 = vsyncadd [#allocation6], 4294967264 }
0x3380   :  { %2102 = vsyncpa [#allocation5], 1 }
0x3381   :  { %2103 = vsyncpa [#allocation8], 1 }
0x3382   :  { %2104 = vsyncpa [#allocation6], 1 }

</bundles_post_ra>
